<compile_context>
chip_gen: v6e
topology: v6e:2x2x1
jax: 0.10.0
libtpu: 0.0.40
codegen_flags: <defaults>
</compile_context>

<pallas_src>
import jax
import jax.numpy as jnp
from jax.experimental import pallas as pl
from jax.experimental.pallas import tpu as pltpu

LATENT_DIMS = 2
IN_DIM = 784          # 1 * 28 * 28
PAD_DIM = 896         # 7 * 128: lane-dense feature dim (784 rounded up to 128)
HID_DIM = 512
MAX_TILE_B = 512      # larger tiles amortize the ~0.35us per-grid-step overhead


def _round_up(x, m):
    return ((x + m - 1) // m) * m


def autoencoder_kernel(x_ref,
                       w1_ref, b1_ref,   # encoder linear1: 896(784) -> 512 ; bf16 W / f32 b
                       w2_ref, b2_ref,   # encoder linear2: 512 -> 2         ; f32
                       w3_ref, b3_ref,   # decoder linear1: 2 -> 512         ; f32
                       w4_ref, b4_ref,   # decoder linear2: 512 -> 896(784)  ; bf16 W / f32 b
                       o_ref):
    x = x_ref[...]                                              # (TILE_B, 896) bf16

    # ---- Encoder ----
    # Big matmul: bf16 operands, f32 accumulation; epilogue stays f32.
    h1 = jnp.dot(x, w1_ref[...], preferred_element_type=jnp.float32) + b1_ref[...]
    h1 = jnp.maximum(h1, 0.0)                                   # relu (f32)
    # Tiny 512->2 matmul: <1% of FLOPs, keep f32 for latent precision.
    z = jnp.dot(h1, w2_ref[...], preferred_element_type=jnp.float32) + b2_ref[...]

    # ---- Decoder ----
    h2 = jnp.dot(z, w3_ref[...], preferred_element_type=jnp.float32) + b3_ref[...]
    h2 = jnp.maximum(h2, 0.0)                                   # relu (f32)
    logits = jnp.dot(h2.astype(jnp.bfloat16), w4_ref[...],
                     preferred_element_type=jnp.float32) + b4_ref[...]
    o_ref[...] = jax.nn.sigmoid(logits).astype(o_ref.dtype)     # (TILE_B, 896) bf16


def init_params(key):
    """Deterministic parameter init (PyTorch nn.Linear-style uniform bounds)."""
    ks = jax.random.split(key, 8)

    def linear(kw, kb, fan_in, fan_out):
        bound = 1.0 / jnp.sqrt(fan_in)
        w = jax.random.uniform(kw, (fan_in, fan_out), jnp.float32, -bound, bound)
        b = jax.random.uniform(kb, (1, fan_out), jnp.float32, -bound, bound)
        return w, b

    w1, b1 = linear(ks[0], ks[1], IN_DIM, HID_DIM)       # encoder.linear1
    w2, b2 = linear(ks[2], ks[3], HID_DIM, LATENT_DIMS)  # encoder.linear2
    w3, b3 = linear(ks[4], ks[5], LATENT_DIMS, HID_DIM)  # decoder.linear1
    w4, b4 = linear(ks[6], ks[7], HID_DIM, IN_DIM)       # decoder.linear2
    return (w1, b1, w2, b2, w3, b3, w4, b4)


def _prepare_params(params):
    """One-time (wrapper-side, not per-grid-step) pad + dtype conversion."""
    w1, b1, w2, b2, w3, b3, w4, b4 = params
    pad = PAD_DIM - IN_DIM
    w1p = jnp.pad(w1, ((0, pad), (0, 0))).astype(jnp.bfloat16)   # zero rows: no effect
    w4p = jnp.pad(w4, ((0, 0), (0, pad))).astype(jnp.bfloat16)   # zero cols: sliced off
    b4p = jnp.pad(b4.astype(jnp.float32), ((0, 0), (0, pad)))
    return (w1p, b1.astype(jnp.float32),
            w2.astype(jnp.float32), b2.astype(jnp.float32),
            w3.astype(jnp.float32), b3.astype(jnp.float32),
            w4p, b4p)


def autoencoder_forward(x_nchw, params):
    B = x_nchw.shape[0]
    prepared = _prepare_params(params)

    # torch.flatten(x, 1); bf16 activations over HBM; lane-pad 784 -> 896.
    x_flat = x_nchw.reshape(B, -1).astype(jnp.bfloat16)
    x_flat = jnp.pad(x_flat, ((0, 0), (0, PAD_DIM - IN_DIM)))

    # Batch tile: aim for >= 2 grid steps (v7x has 2 TensorCores and the batch
    # axis is "parallel"), cap at MAX_TILE_B, round to a sublane multiple of 8.
    tile_b = min(MAX_TILE_B, max(8, _round_up(-(-B // 2), 8)))
    b_pad = _round_up(B, tile_b)
    if b_pad != B:
        x_flat = jnp.pad(x_flat, ((0, b_pad - B), (0, 0)))
    grid = (b_pad // tile_b,)

    # Weights / biases: full-array blocks, constant index_map -> VMEM-resident
    # across all grid steps (no per-step re-DMA).
    def resident_spec(a):
        return pl.BlockSpec(a.shape, lambda i: (0,) * a.ndim)

    in_specs = [pl.BlockSpec((tile_b, PAD_DIM), lambda i: (i, 0))]   # x tile
    in_specs += [resident_spec(p) for p in prepared]
    out_spec = pl.BlockSpec((tile_b, PAD_DIM), lambda i: (i, 0))

    weight_bytes = sum(int(p.size) * p.dtype.itemsize for p in prepared)
    flops = 2 * b_pad * (PAD_DIM * HID_DIM + HID_DIM * LATENT_DIMS
                         + LATENT_DIMS * HID_DIM + HID_DIM * PAD_DIM)
    bytes_accessed = weight_bytes + 2 * b_pad * PAD_DIM * 2          # bf16 x in + out

    out_flat = pl.pallas_call(
        autoencoder_kernel,
        out_shape=jax.ShapeDtypeStruct((b_pad, PAD_DIM), jnp.bfloat16),
        grid=grid,
        in_specs=in_specs,
        out_specs=out_spec,
        compiler_params=pltpu.CompilerParams(
            dimension_semantics=("parallel",),        # megacore sharding on v7x
            vmem_limit_bytes=32 * 1024 * 1024,        # conservative: fits v7x 64 MiB
        ),
        cost_estimate=pl.CostEstimate(
            flops=flops,
            transcendentals=b_pad * PAD_DIM,          # sigmoid
            bytes_accessed=bytes_accessed,
        ),
    )(x_flat, *prepared)

    # Slice off batch/lane padding; return f32 for downstream parity with torch.
    out = out_flat[:B, :IN_DIM].astype(jnp.float32)
    return out.reshape(B, 1, 28, 28)                  # z.reshape((-1, 1, 28, 28))


if __name__ == "__main__":
    key = jax.random.PRNGKey(0)
    k_x, k_p = jax.random.split(key)

    B = 8
    x = jax.random.uniform(k_x, (B, 1, 28, 28), jnp.float32)   # MNIST-like input
    params = init_params(k_p)

    out = autoencoder_forward(x, params)
    out = jax.block_until_ready(out)

    # Pure-JAX f32 reference check (bf16 matmul operands -> relaxed tolerance).
    w1, b1, w2, b2, w3, b3, w4, b4 = params
    xf = x.reshape(B, -1)
    h1 = jnp.maximum(xf @ w1 + b1, 0.0)
    z = h1 @ w2 + b2
    h2 = jnp.maximum(z @ w3 + b3, 0.0)
    ref = jax.nn.sigmoid(h2 @ w4 + b4).reshape(B, 1, 28, 28)

    assert out.shape == (B, 1, 28, 28)
    assert out.dtype == jnp.float32
    assert bool(jnp.all((out >= 0.0) & (out <= 1.0)))          # sigmoid range
    max_err = float(jnp.max(jnp.abs(out - ref)))
    assert max_err < 2e-2, max_err
    print("KERNEL_OK")
</pallas_src>

<mosaic_0001>
module attributes {stable_mosaic.version = 11 : i64} {
  func.func @autoencoder_kernel(%arg0: i32, %arg1: memref<8x896xbf16, #tpu.memory_space<vmem>>, %arg2: memref<896x512xbf16, #tpu.memory_space<vmem>>, %arg3: memref<1x512xf32, #tpu.memory_space<vmem>>, %arg4: memref<512x2xf32, #tpu.memory_space<vmem>>, %arg5: memref<1x2xf32, #tpu.memory_space<vmem>>, %arg6: memref<2x512xf32, #tpu.memory_space<vmem>>, %arg7: memref<1x512xf32, #tpu.memory_space<vmem>>, %arg8: memref<512x896xbf16, #tpu.memory_space<vmem>>, %arg9: memref<1x896xf32, #tpu.memory_space<vmem>>, %arg10: memref<8x896xbf16, #tpu.memory_space<vmem>>) attributes {dimension_semantics = [#tpu.dimension_semantics<parallel>], iteration_bounds = array<i64: 1>, scalar_prefetch = 0 : i64, scratch_operands = 0 : i64, tpu.core_type = #tpu.core_type<tc>, window_params = [{transform_indices = @transform_0, window_bounds = array<i64: 8, 896>}, {pipeline_mode = #tpu.pipeline_mode<synchronous>, transform_indices = @transform_1, window_bounds = array<i64: 896, 512>}, {pipeline_mode = #tpu.pipeline_mode<synchronous>, transform_indices = @transform_2, window_bounds = array<i64: 1, 512>}, {pipeline_mode = #tpu.pipeline_mode<synchronous>, transform_indices = @transform_3, window_bounds = array<i64: 512, 2>}, {pipeline_mode = #tpu.pipeline_mode<synchronous>, transform_indices = @transform_4, window_bounds = array<i64: 1, 2>}, {pipeline_mode = #tpu.pipeline_mode<synchronous>, transform_indices = @transform_5, window_bounds = array<i64: 2, 512>}, {pipeline_mode = #tpu.pipeline_mode<synchronous>, transform_indices = @transform_6, window_bounds = array<i64: 1, 512>}, {pipeline_mode = #tpu.pipeline_mode<synchronous>, transform_indices = @transform_7, window_bounds = array<i64: 512, 896>}, {pipeline_mode = #tpu.pipeline_mode<synchronous>, transform_indices = @transform_8, window_bounds = array<i64: 1, 896>}, {transform_indices = @transform_9, window_bounds = array<i64: 8, 896>}]} {
    %c0 = arith.constant 0 : index
    %c0_0 = arith.constant 0 : index
    %0 = vector.load %arg1[%c0, %c0_0] : memref<8x896xbf16, #tpu.memory_space<vmem>>, vector<8x896xbf16>
    %c0_1 = arith.constant 0 : index
    %c0_2 = arith.constant 0 : index
    %1 = vector.load %arg2[%c0_1, %c0_2] : memref<896x512xbf16, #tpu.memory_space<vmem>>, vector<896x512xbf16>
    %cst = arith.constant dense<0.000000e+00> : vector<8x512xf32>
    %2 = tpu.matmul %0, %1, %cst {dimension_numbers = #tpu.dot_dimension_numbers<[1], [0], [0], [1], [0, 0, 1, 1], [], []>} : vector<8x896xbf16>, vector<896x512xbf16>, vector<8x512xf32> -> vector<8x512xf32>
    %c0_3 = arith.constant 0 : index
    %c0_4 = arith.constant 0 : index
    %3 = vector.load %arg3[%c0_3, %c0_4] : memref<1x512xf32, #tpu.memory_space<vmem>>, vector<1x512xf32>
    %4 = vector.broadcast %3 : vector<1x512xf32> to vector<8x512xf32>
    %5 = arith.addf %2, %4 : vector<8x512xf32>
    %cst_5 = arith.constant 0.000000e+00 : f32
    %6 = vector.broadcast %cst_5 : f32 to vector<8x512xf32>
    %7 = arith.maximumf %5, %6 : vector<8x512xf32>
    %c0_6 = arith.constant 0 : index
    %c0_7 = arith.constant 0 : index
    %8 = vector.load %arg4[%c0_6, %c0_7] : memref<512x2xf32, #tpu.memory_space<vmem>>, vector<512x2xf32>
    %cst_8 = arith.constant dense<0.000000e+00> : vector<8x2xf32>
    %9 = tpu.matmul %7, %8, %cst_8 {dimension_numbers = #tpu.dot_dimension_numbers<[1], [0], [0], [1], [0, 0, 1, 1], [], []>} : vector<8x512xf32>, vector<512x2xf32>, vector<8x2xf32> -> vector<8x2xf32>
    %c0_9 = arith.constant 0 : index
    %c0_10 = arith.constant 0 : index
    %10 = vector.load %arg5[%c0_9, %c0_10] : memref<1x2xf32, #tpu.memory_space<vmem>>, vector<1x2xf32>
    %11 = vector.broadcast %10 : vector<1x2xf32> to vector<8x2xf32>
    %12 = arith.addf %9, %11 : vector<8x2xf32>
    %c0_11 = arith.constant 0 : index
    %c0_12 = arith.constant 0 : index
    %13 = vector.load %arg6[%c0_11, %c0_12] : memref<2x512xf32, #tpu.memory_space<vmem>>, vector<2x512xf32>
    %cst_13 = arith.constant dense<0.000000e+00> : vector<8x512xf32>
    %14 = tpu.matmul %12, %13, %cst_13 {dimension_numbers = #tpu.dot_dimension_numbers<[1], [0], [0], [1], [0, 0, 1, 1], [], []>} : vector<8x2xf32>, vector<2x512xf32>, vector<8x512xf32> -> vector<8x512xf32>
    %c0_14 = arith.constant 0 : index
    %c0_15 = arith.constant 0 : index
    %15 = vector.load %arg7[%c0_14, %c0_15] : memref<1x512xf32, #tpu.memory_space<vmem>>, vector<1x512xf32>
    %16 = vector.broadcast %15 : vector<1x512xf32> to vector<8x512xf32>
    %17 = arith.addf %14, %16 : vector<8x512xf32>
    %cst_16 = arith.constant 0.000000e+00 : f32
    %18 = vector.broadcast %cst_16 : f32 to vector<8x512xf32>
    %19 = arith.maximumf %17, %18 : vector<8x512xf32>
    %20 = arith.truncf %19 : vector<8x512xf32> to vector<8x512xbf16>
    %c0_17 = arith.constant 0 : index
    %c0_18 = arith.constant 0 : index
    %21 = vector.load %arg8[%c0_17, %c0_18] : memref<512x896xbf16, #tpu.memory_space<vmem>>, vector<512x896xbf16>
    %cst_19 = arith.constant dense<0.000000e+00> : vector<8x896xf32>
    %22 = tpu.matmul %20, %21, %cst_19 {dimension_numbers = #tpu.dot_dimension_numbers<[1], [0], [0], [1], [0, 0, 1, 1], [], []>} : vector<8x512xbf16>, vector<512x896xbf16>, vector<8x896xf32> -> vector<8x896xf32>
    %c0_20 = arith.constant 0 : index
    %c0_21 = arith.constant 0 : index
    %23 = vector.load %arg9[%c0_20, %c0_21] : memref<1x896xf32, #tpu.memory_space<vmem>>, vector<1x896xf32>
    %24 = vector.broadcast %23 : vector<1x896xf32> to vector<8x896xf32>
    %25 = arith.addf %22, %24 : vector<8x896xf32>
    %26 = arith.negf %25 : vector<8x896xf32>
    %27 = math.exp %26 : vector<8x896xf32>
    %cst_22 = arith.constant 1.000000e+00 : f32
    %28 = vector.broadcast %cst_22 : f32 to vector<8x896xf32>
    %29 = arith.addf %28, %27 : vector<8x896xf32>
    %30 = arith.divf %28, %29 : vector<8x896xf32>
    %31 = arith.truncf %30 : vector<8x896xf32> to vector<8x896xbf16>
    %c0_23 = arith.constant 0 : index
    %c0_24 = arith.constant 0 : index
    %32 = vector.load %arg10[%c0_23, %c0_24] : memref<8x896xbf16, #tpu.memory_space<vmem>>, vector<8x896xbf16>
    tpu.vector_store %arg10[%c0_23, %c0_24], %31 {strides = array<i32>} : memref<8x896xbf16, #tpu.memory_space<vmem>>, vector<8x896xbf16>,
    return
  }
  func.func @transform_0(%arg0: i32) -> (i32, i32) {
    %c0_i32 = arith.constant 0 : i32
    %c0_i32_0 = arith.constant 0 : i32
    return %arg0, %c0_i32 : i32, i32
  }
  func.func @transform_1(%arg0: i32) -> (i32, i32) {
    %c0_i32 = arith.constant 0 : i32
    %c0_i32_0 = arith.constant 0 : i32
    %c0_i32_1 = arith.constant 0 : i32
    return %c0_i32, %c0_i32_0 : i32, i32
  }
  func.func @transform_2(%arg0: i32) -> (i32, i32) {
    %c0_i32 = arith.constant 0 : i32
    %c0_i32_0 = arith.constant 0 : i32
    %c0_i32_1 = arith.constant 0 : i32
    return %c0_i32, %c0_i32_0 : i32, i32
  }
  func.func @transform_3(%arg0: i32) -> (i32, i32) {
    %c0_i32 = arith.constant 0 : i32
    %c0_i32_0 = arith.constant 0 : i32
    %c0_i32_1 = arith.constant 0 : i32
    return %c0_i32, %c0_i32_0 : i32, i32
  }
  func.func @transform_4(%arg0: i32) -> (i32, i32) {
    %c0_i32 = arith.constant 0 : i32
    %c0_i32_0 = arith.constant 0 : i32
    %c0_i32_1 = arith.constant 0 : i32
    return %c0_i32, %c0_i32_0 : i32, i32
  }
  func.func @transform_5(%arg0: i32) -> (i32, i32) {
    %c0_i32 = arith.constant 0 : i32
    %c0_i32_0 = arith.constant 0 : i32
    %c0_i32_1 = arith.constant 0 : i32
    return %c0_i32, %c0_i32_0 : i32, i32
  }
  func.func @transform_6(%arg0: i32) -> (i32, i32) {
    %c0_i32 = arith.constant 0 : i32
    %c0_i32_0 = arith.constant 0 : i32
    %c0_i32_1 = arith.constant 0 : i32
    return %c0_i32, %c0_i32_0 : i32, i32
  }
  func.func @transform_7(%arg0: i32) -> (i32, i32) {
    %c0_i32 = arith.constant 0 : i32
    %c0_i32_0 = arith.constant 0 : i32
    %c0_i32_1 = arith.constant 0 : i32
    return %c0_i32, %c0_i32_0 : i32, i32
  }
  func.func @transform_8(%arg0: i32) -> (i32, i32) {
    %c0_i32 = arith.constant 0 : i32
    %c0_i32_0 = arith.constant 0 : i32
    %c0_i32_1 = arith.constant 0 : i32
    return %c0_i32, %c0_i32_0 : i32, i32
  }
  func.func @transform_9(%arg0: i32) -> (i32, i32) {
    %c0_i32 = arith.constant 0 : i32
    %c0_i32_0 = arith.constant 0 : i32
    return %arg0, %c0_i32 : i32, i32
  }
}

</mosaic_0001>

<bundles_post_ra>
// kernel: tpu_custom_call.1
= control target key start
LH: loop header
LB: loop body
LE: loop exit
PB: predicated region body
PF: predicated region fallthrough
CT: control target
= control target key end

     0   :  { %14 = vsyncpa [#allocation3], 0  ;;  %s5824_s0 = inlined_call_operand.vmem [shape: bf16[8,896], index: 0, kind: input, shape index: {}]   ;;  %s5825_s1 = inlined_call_operand.hbm [shape: bf16[896,512], index: 1, kind: input, shape index: {}]   ;;  %s5826_s2 = inlined_call_operand.vmem [shape: f32[1,512], index: 2, kind: input, shape index: {}]   ;;  %s5827_s3 = inlined_call_operand.vmem [shape: f32[512,2], index: 3, kind: input, shape index: {}]   ;;  %s5828_s4 = inlined_call_operand.vmem [shape: f32[1,2], index: 4, kind: input, shape index: {}]   ;;  %s5829_s5 = inlined_call_operand.vmem [shape: f32[2,512], index: 5, kind: input, shape index: {}]   ;;  %s5830_s6 = inlined_call_operand.vmem [shape: f32[1,512], index: 6, kind: input, shape index: {}]   ;;  %s5831_s7 = inlined_call_operand.hbm [shape: bf16[512,896], index: 7, kind: input, shape index: {}]   ;;  %s5832_s8 = inlined_call_operand.vmem [shape: f32[1,896], index: 8, kind: input, shape index: {}]   ;;  %s5833_s9 = inlined_call_operand.hbm [shape: bf16[8,896], index: 9, kind: output, shape index: {}]  }
   0x1   :  { %15 = vsyncpa [#allocation6], 0 }
   0x2   :  { %16 = vsyncpa [#allocation4], 0  ;;  %s5426_s30 = smov [#allocation2]  }
   0x3   :  { %s24_s10 = sshll.u32 %s5426_s30, 4  ;;  %s25_s10 = int_to_ptr.vmem [resolvable:$true] %s24_s10 }
   0x4   :  { %s5368_s11 = scalar_lea.vmem %s25_s10, 28672  ;;  %p5373_p1 = scmp.lt.s32.totalorder %s25_s10, %s25_s10 }
   0x5   :  { %p5369_p0 = scmp.ne.s32.totalorder %s25_s10, %s5368_s11  ;;  %p5374_p2 = scmp.lt.s32.totalorder %s5368_s11, %s5368_s11 }
   0x7   :  { %p5375_p3 = por %p5374_p2, %p5373_p1 }
   0x9   :  { %p5376_p4 = pnand %p5375_p3, %p5369_p0 }
   0xb   :  { %5379 = shalt.err (!%p5376_p4)
}
   0xc   :  { %s5427_s12 = smov 256   ;;  %s5428_s13 = smov 16  }
   0xd   :  { %30 = dma.hbm_to_vmem [thread:$0]  %s5825_s1, 28672, %s25_s10, [#allocation3], %s5427_s12, %s5427_s12, %s5428_s13  }
   0xe   :  { %s5429_s16 = smov [#allocation5]  }
   0xf   :  { %s46_s17 = sshll.u32 %s5429_s16, 4  ;;  %s47_s17 = int_to_ptr.vmem [resolvable:$true] %s46_s17 }
  0x10   :  { %s5388_s18 = scalar_lea.vmem %s47_s17, 28672  ;;  %p5393_p6 = scmp.lt.s32.totalorder %s47_s17, %s47_s17 }
  0x11   :  { %p5389_p5 = scmp.ne.s32.totalorder %s47_s17, %s5388_s18  ;;  %p5394_p7 = scmp.lt.s32.totalorder %s5388_s18, %s5388_s18 }
  0x13   :  { %p5395_p8 = por %p5394_p7, %p5393_p6 }
  0x15   :  { %p5396_p9 = pnand %p5395_p8, %p5389_p5 }
  0x17   :  { %5399 = shalt.err (!%p5396_p9)
}
  0x18   :  { %s5430_s19 = smov 448   ;;  %s5431_s20 = smov 28  }
  0x19   :  { %52 = dma.hbm_to_vmem [thread:$0]  %s5831_s7, 28672, %s47_s17, [#allocation6], %s5430_s19, %s5430_s19, %s5431_s20  }
  0x1a   :  { %5420 = dma.done.wait [#allocation3], 28672  }
  0x1b   :  { %5421 = vsyncadd [#allocation3], 4294938624 }
  0x1c   :  { %5422 = dma.done.wait [#allocation6], 28672  }
  0x1d   :  { %5423 = vsyncadd [#allocation6], 4294938624  ;;  %v4667_v0 = vld [vmem:[#allocation2 + $0xe4] ss:$16 sps:$4 sm:$0xff]   ;;  %v4671_v2 = vld [vmem:[#allocation2 + $0xe0] ss:$16 sps:$4 sm:$0xff]  }
  0x1e   :  { %v4669_v1 = vld [vmem:[#allocation2 + $0x2e4] ss:$16 sps:$4 sm:$0xff]   ;;  %1457 = vmatprep.subr.bf16.mxu0 %v4667_v0  ;;  %v4672_v3 = vld [vmem:[#allocation2 + $0x2e0] ss:$16 sps:$4 sm:$0xff]   ;;  %v63_v48 = vld [vmem:[%s5824_s0 + $0x8] sm:$0xff]  ;;  %vm2045_vm0 = vcmask 1041408  }
  0x1f   :  { %1498 = vmatprep.subr.bf16.mxu1 %v4669_v1  ;;  %v4673_v4 = vld [vmem:[#allocation2 + $0xc4] ss:$16 sps:$4 sm:$0xff]   ;;  %1458 = vmatpush1.bf16.msra.mxu0 %v4671_v2  ;;  %v4677_v6 = vld [vmem:[#allocation2 + $0xc0] ss:$16 sps:$4 sm:$0xff]   ;;  %v5500_v51 = vcombine.high %v63_v48, %v63_v48  ;;  %vm2041_vm1 = vcmask 15360  }
  0x20   :  { %1499 = vmatpush1.bf16.msra.mxu1 %v4672_v3  ;;  %v4675_v5 = vld [vmem:[#allocation2 + $0x2c4] ss:$16 sps:$4 sm:$0xff]   ;;  %1459 = vmatprep.subr.bf16.mxu0 %v4673_v4  ;;  %v4678_v7 = vld [vmem:[#allocation2 + $0x2c0] ss:$16 sps:$4 sm:$0xff]  }
  0x21   :  { %1500 = vmatprep.subr.bf16.mxu1 %v4675_v5  ;;  %v4679_v8 = vld [vmem:[#allocation2 + $0xa4] ss:$16 sps:$4 sm:$0xff]   ;;  %v4683_v10 = vld [vmem:[#allocation2 + $0xa0] ss:$16 sps:$4 sm:$0xff]   ;;  %1530 = vmatprep.mubr.bf16.mxu1 %v5500_v51 }
  0x22   :  { %v4681_v9 = vld [vmem:[#allocation2 + $0x2a4] ss:$16 sps:$4 sm:$0xff]   ;;  %v4684_v11 = vld [vmem:[#allocation2 + $0x2a0] ss:$16 sps:$4 sm:$0xff]  }
  0x23   :  { %1460 = vmatpush1.bf16.msra.mxu0 %v4677_v6  ;;  %v4685_v12 = vld [vmem:[#allocation2 + $0x84] ss:$16 sps:$4 sm:$0xff]   ;;  %v4689_v14 = vld [vmem:[#allocation2 + $0x80] ss:$16 sps:$4 sm:$0xff]  }
  0x24   :  { %1501 = vmatpush1.bf16.msra.mxu1 %v4678_v7  ;;  %1461 = vmatprep.subr.bf16.mxu0 %v4679_v8  ;;  %v4687_v13 = vld [vmem:[#allocation2 + $0x284] ss:$16 sps:$4 sm:$0xff]   ;;  %v4690_v15 = vld [vmem:[#allocation2 + $0x280] ss:$16 sps:$4 sm:$0xff]   ;;  %v5506_v7 = vcombine.low %v63_v48, %v63_v48  ;;  %v4827_v48 = vld [vmem:[#allocation2 + $0xcc] ss:$16 sps:$4 sm:$0xff]  }
  0x25   :  { %1502 = vmatprep.subr.bf16.mxu1 %v4681_v9  ;;  %v4691_v16 = vld [vmem:[#allocation2 + $0x64] ss:$16 sps:$4 sm:$0xff]   ;;  %v4695_v18 = vld [vmem:[#allocation2 + $0x60] ss:$16 sps:$4 sm:$0xff]  }
  0x26   :  { %v4693_v17 = vld [vmem:[#allocation2 + $0x264] ss:$16 sps:$4 sm:$0xff]   ;;  %v4696_v19 = vld [vmem:[#allocation2 + $0x260] ss:$16 sps:$4 sm:$0xff]  }
  0x27   :  { %1462 = vmatpush1.bf16.msra.mxu0 %v4683_v10  ;;  %v4697_v20 = vld [vmem:[#allocation2 + $0x44] ss:$16 sps:$4 sm:$0xff]   ;;  %v4701_v22 = vld [vmem:[#allocation2 + $0x40] ss:$16 sps:$4 sm:$0xff]  }
  0x28   :  { %1503 = vmatpush1.bf16.msra.mxu1 %v4684_v11  ;;  %1463 = vmatprep.subr.bf16.mxu0 %v4685_v12  ;;  %v4699_v21 = vld [vmem:[#allocation2 + $0x244] ss:$16 sps:$4 sm:$0xff]   ;;  %v4702_v23 = vld [vmem:[#allocation2 + $0x240] ss:$16 sps:$4 sm:$0xff]  }
  0x29   :  { %1504 = vmatprep.subr.bf16.mxu1 %v4687_v13  ;;  %v4703_v24 = vld [vmem:[#allocation2 + $0x24] ss:$16 sps:$4 sm:$0xff]   ;;  %v4707_v26 = vld [vmem:[#allocation2 + $0x20] ss:$16 sps:$4 sm:$0xff]  }
  0x2a   :  { %v4705_v25 = vld [vmem:[#allocation2 + $0x224] ss:$16 sps:$4 sm:$0xff]   ;;  %v4708_v27 = vld [vmem:[#allocation2 + $0x220] ss:$16 sps:$4 sm:$0xff]  }
  0x2b   :  { %1464 = vmatpush1.bf16.msra.mxu0 %v4689_v14  ;;  %v4709_v28 = vld [vmem:[#allocation2 + $0x4] ss:$16 sps:$4 sm:$0xff]   ;;  %v4713_v30 = vld [vmem:[#allocation2] ss:$16 sps:$4 sm:$0xff]  }
  0x2c   :  { %1505 = vmatpush1.bf16.msra.mxu1 %v4690_v15  ;;  %1465 = vmatprep.subr.bf16.mxu0 %v4691_v16  ;;  %v4711_v29 = vld [vmem:[#allocation2 + $0x204] ss:$16 sps:$4 sm:$0xff]   ;;  %v4714_v31 = vld [vmem:[#allocation2 + $0x200] ss:$16 sps:$4 sm:$0xff]   ;;  %v5432_v16 = vmov 0  }
  0x2d   :  { %1506 = vmatprep.subr.bf16.mxu1 %v4693_v17  ;;  %v4715_v32 = vld [vmem:[#allocation2 + $0x1e4] ss:$16 sps:$4 sm:$0xff]   ;;  %v4719_v34 = vld [vmem:[#allocation2 + $0x1e0] ss:$16 sps:$4 sm:$0xff]  }
  0x2e   :  { %v4717_v33 = vld [vmem:[#allocation2 + $0x3e4] ss:$16 sps:$4 sm:$0xff]   ;;  %v4720_v35 = vld [vmem:[#allocation2 + $0x3e0] ss:$16 sps:$4 sm:$0xff]  }
  0x2f   :  { %1466 = vmatpush1.bf16.msra.mxu0 %v4695_v18  ;;  %v4721_v36 = vld [vmem:[#allocation2 + $0x1c4] ss:$16 sps:$4 sm:$0xff]   ;;  %v4725_v38 = vld [vmem:[#allocation2 + $0x1c0] ss:$16 sps:$4 sm:$0xff]  }
  0x30   :  { %1507 = vmatpush1.bf16.msra.mxu1 %v4696_v19  ;;  %1467 = vmatprep.subr.bf16.mxu0 %v4697_v20  ;;  %v4723_v37 = vld [vmem:[#allocation2 + $0x3c4] ss:$16 sps:$4 sm:$0xff]   ;;  %v4726_v39 = vld [vmem:[#allocation2 + $0x3c0] ss:$16 sps:$4 sm:$0xff]  }
  0x31   :  { %1508 = vmatprep.subr.bf16.mxu1 %v4699_v21  ;;  %v4727_v40 = vld [vmem:[#allocation2 + $0x1a4] ss:$16 sps:$4 sm:$0xff]   ;;  %v4731_v42 = vld [vmem:[#allocation2 + $0x1a0] ss:$16 sps:$4 sm:$0xff]  }
  0x32   :  { %v4729_v41 = vld [vmem:[#allocation2 + $0x3a4] ss:$16 sps:$4 sm:$0xff]   ;;  %v4732_v43 = vld [vmem:[#allocation2 + $0x3a0] ss:$16 sps:$4 sm:$0xff]  }
  0x33   :  { %1468 = vmatpush1.bf16.msra.mxu0 %v4701_v22  ;;  %v4733_v44 = vld [vmem:[#allocation2 + $0x184] ss:$16 sps:$4 sm:$0xff]   ;;  %v4737_v49 = vld [vmem:[#allocation2 + $0x180] ss:$16 sps:$4 sm:$0xff]  }
  0x34   :  { %1509 = vmatpush1.bf16.msra.mxu1 %v4702_v23  ;;  %1469 = vmatprep.subr.bf16.mxu0 %v4703_v24  ;;  %v4735_v45 = vld [vmem:[#allocation2 + $0x384] ss:$16 sps:$4 sm:$0xff]   ;;  %v4738_v50 = vld [vmem:[#allocation2 + $0x380] ss:$16 sps:$4 sm:$0xff]  }
  0x35   :  { %1510 = vmatprep.subr.bf16.mxu1 %v4705_v25  ;;  %v62_v46 = vld [vmem:[%s5824_s0] sm:$0xff] }
  0x36   :  { %v5495_v47 = vcombine.high %v62_v46, %v62_v46  ;;  %v4739_v52 = vld [vmem:[#allocation2 + $0x164] ss:$16 sps:$4 sm:$0xff]   ;;  %v4743_v54 = vld [vmem:[#allocation2 + $0x160] ss:$16 sps:$4 sm:$0xff]   ;;  %v5504_v6 = vcombine.low %v62_v46, %v62_v46 }
  0x37   :  { %1470 = vmatpush1.bf16.msra.mxu0 %v4707_v26  ;;  %v4741_v53 = vld [vmem:[#allocation2 + $0x364] ss:$16 sps:$4 sm:$0xff]   ;;  %v4744_v55 = vld [vmem:[#allocation2 + $0x360] ss:$16 sps:$4 sm:$0xff]  }
  0x38   :  { %1511 = vmatpush1.bf16.msra.mxu1 %v4708_v27  ;;  %1471 = vmatprep.subr.bf16.mxu0 %v4709_v28  ;;  %v4745_v56 = vld [vmem:[#allocation2 + $0x144] ss:$16 sps:$4 sm:$0xff]   ;;  %v4749_v58 = vld [vmem:[#allocation2 + $0x140] ss:$16 sps:$4 sm:$0xff]  }
  0x39   :  { %1512 = vmatprep.subr.bf16.mxu1 %v4711_v29  ;;  %1489 = vmatprep.mubr.bf16.mxu0 %v5495_v47  ;;  %v4747_v57 = vld [vmem:[#allocation2 + $0x344] ss:$16 sps:$4 sm:$0xff]   ;;  %v4750_v59 = vld [vmem:[#allocation2 + $0x340] ss:$16 sps:$4 sm:$0xff]  }
  0x3a   :  { %v4751_v60 = vld [vmem:[#allocation2 + $0x124] ss:$16 sps:$4 sm:$0xff]   ;;  %v4755_v62 = vld [vmem:[#allocation2 + $0x120] ss:$16 sps:$4 sm:$0xff]  }
  0x3b   :  { %1472 = vmatpush1.bf16.msra.mxu0 %v4713_v30  ;;  %v4753_v61 = vld [vmem:[#allocation2 + $0x324] ss:$16 sps:$4 sm:$0xff]   ;;  %v4756_v63 = vld [vmem:[#allocation2 + $0x320] ss:$16 sps:$4 sm:$0xff]  }
  0x3c   :  { %1513 = vmatpush1.bf16.msra.mxu1 %v4714_v31  ;;  %1473 = vmatprep.subr.bf16.mxu0 %v4715_v32  ;;  %v4757_v0 = vld [vmem:[#allocation2 + $0x104] ss:$16 sps:$4 sm:$0xff]   ;;  %v4761_v2 = vld [vmem:[#allocation2 + $0x100] ss:$16 sps:$4 sm:$0xff]  }
  0x3d   :  { %1514 = vmatprep.subr.bf16.mxu1 %v4717_v33  ;;  %v4759_v1 = vld [vmem:[#allocation2 + $0x304] ss:$16 sps:$4 sm:$0xff]   ;;  %v4762_v3 = vld [vmem:[#allocation2 + $0x300] ss:$16 sps:$4 sm:$0xff]  }
  0x3e   :  { %v4769_v4 = vld [vmem:[#allocation2 + $0x4e4] ss:$16 sps:$4 sm:$0xff]   ;;  %v4767_v8 = vld [vmem:[#allocation2 + $0x4e0] ss:$16 sps:$4 sm:$0xff]  }
  0x3f   :  { %1474 = vmatpush2.bf16.msra.mxu0 %v4719_v34  ;;  %v4772_v5 = vld [vmem:[#allocation2 + $0x6e4] ss:$16 sps:$4 sm:$0xff]   ;;  %v4770_v9 = vld [vmem:[#allocation2 + $0x6e0] ss:$16 sps:$4 sm:$0xff]  }
  0x40   :  { %1515 = vmatpush2.bf16.msra.mxu1 %v4720_v35  ;;  %1475 = vmatprep.subr.bf16.mxu0 %v4721_v36  ;;  %v4775_v10 = vld [vmem:[#allocation2 + $0x4c4] ss:$16 sps:$4 sm:$0xff]   ;;  %v4773_v12 = vld [vmem:[#allocation2 + $0x4c0] ss:$16 sps:$4 sm:$0xff]  }
  0x41   :  { %1516 = vmatprep.subr.bf16.mxu1 %v4723_v37  ;;  %v4778_v11 = vld [vmem:[#allocation2 + $0x6c4] ss:$16 sps:$4 sm:$0xff]   ;;  %v4776_v13 = vld [vmem:[#allocation2 + $0x6c0] ss:$16 sps:$4 sm:$0xff]  }
  0x42   :  { %v4781_v14 = vld [vmem:[#allocation2 + $0x4a4] ss:$16 sps:$4 sm:$0xff]   ;;  %v4779_v17 = vld [vmem:[#allocation2 + $0x4a0] ss:$16 sps:$4 sm:$0xff]  }
  0x43   :  { %1476 = vmatpush2.bf16.msra.mxu0 %v4725_v38  ;;  %v4784_v15 = vld [vmem:[#allocation2 + $0x6a4] ss:$16 sps:$4 sm:$0xff]   ;;  %v4782_v18 = vld [vmem:[#allocation2 + $0x6a0] ss:$16 sps:$4 sm:$0xff]  }
  0x44   :  { %1517 = vmatpush2.bf16.msra.mxu1 %v4726_v39  ;;  %1477 = vmatprep.subr.bf16.mxu0 %v4727_v40  ;;  %v4787_v19 = vld [vmem:[#allocation2 + $0x484] ss:$16 sps:$4 sm:$0xff]   ;;  %v4785_v21 = vld [vmem:[#allocation2 + $0x480] ss:$16 sps:$4 sm:$0xff]  }
  0x45   :  { %1518 = vmatprep.subr.bf16.mxu1 %v4729_v41  ;;  %v4790_v20 = vld [vmem:[#allocation2 + $0x684] ss:$16 sps:$4 sm:$0xff]   ;;  %v4788_v22 = vld [vmem:[#allocation2 + $0x680] ss:$16 sps:$4 sm:$0xff]  }
  0x46   :  { %v4793_v23 = vld [vmem:[#allocation2 + $0x464] ss:$16 sps:$4 sm:$0xff]   ;;  %v4791_v25 = vld [vmem:[#allocation2 + $0x460] ss:$16 sps:$4 sm:$0xff]  }
  0x47   :  { %1478 = vmatpush2.bf16.msra.mxu0 %v4731_v42  ;;  %v4796_v24 = vld [vmem:[#allocation2 + $0x664] ss:$16 sps:$4 sm:$0xff]   ;;  %v4794_v26 = vld [vmem:[#allocation2 + $0x660] ss:$16 sps:$4 sm:$0xff]   ;;  %v4821_v42 = vld [vmem:[#allocation2 + $0xec] ss:$16 sps:$4 sm:$0xff]  }
  0x48   :  { %1519 = vmatpush2.bf16.msra.mxu1 %v4732_v43  ;;  %1479 = vmatprep.subr.bf16.mxu0 %v4733_v44  ;;  %v4799_v27 = vld [vmem:[#allocation2 + $0x444] ss:$16 sps:$4 sm:$0xff]   ;;  %v4797_v29 = vld [vmem:[#allocation2 + $0x440] ss:$16 sps:$4 sm:$0xff]   ;;  %v4818_v44 = vld [vmem:[%s5824_s0 + $0x18] ss:$0 sps:$4 sm:$0xff]  }
  0x49   :  { %1520 = vmatprep.subr.bf16.mxu1 %v4735_v45  ;;  %v4802_v28 = vld [vmem:[#allocation2 + $0x644] ss:$16 sps:$4 sm:$0xff]   ;;  %v4800_v30 = vld [vmem:[#allocation2 + $0x640] ss:$16 sps:$4 sm:$0xff]   ;;  %v4819_v45 = vld [vmem:[#allocation2 + $0xe8] ss:$16 sps:$4 sm:$0xff]  }
  0x4a   :  { %v4805_v31 = vld [vmem:[#allocation2 + $0x424] ss:$16 sps:$4 sm:$0xff]   ;;  %v4803_v34 = vld [vmem:[#allocation2 + $0x420] ss:$16 sps:$4 sm:$0xff]  }
  0x4b   :  { %1480 = vmatpush2.bf16.msra.mxu0 %v4737_v49  ;;  %v4808_v32 = vld [vmem:[#allocation2 + $0x624] ss:$16 sps:$4 sm:$0xff]   ;;  %v4806_v36 = vld [vmem:[#allocation2 + $0x620] ss:$16 sps:$4 sm:$0xff]  }
  0x4c   :  { %1521 = vmatpush2.bf16.msra.mxu1 %v4738_v50  ;;  %1481 = vmatprep.subr.bf16.mxu0 %v4739_v52  ;;  %v5514_v33 = vld [vmem:[%s5824_s0 + $0x10] sm:$0xff]  ;;  %v4825_v50 = vld [vmem:[#allocation2 + $0xc8] ss:$16 sps:$4 sm:$0xff]  }
  0x4d   :  { %1522 = vmatprep.subr.bf16.mxu1 %v4741_v53  ;;  %v5518_v35 = vcombine.high %v5514_v33, %v5514_v33  ;;  %v4811_v37 = vld [vmem:[#allocation2 + $0x404] ss:$16 sps:$4 sm:$0xff]   ;;  %v4809_v39 = vld [vmem:[#allocation2 + $0x400] ss:$16 sps:$4 sm:$0xff]   ;;  %v4833_v53 = vld [vmem:[#allocation2 + $0xac] ss:$16 sps:$4 sm:$0xff]  }
  0x4e   :  { %v4814_v38 = vld [vmem:[#allocation2 + $0x604] ss:$16 sps:$4 sm:$0xff]   ;;  %v4812_v40 = vld [vmem:[#allocation2 + $0x600] ss:$16 sps:$4 sm:$0xff]  }
  0x4f   :  { %1482 = vmatpush2.bf16.msra.mxu0 %v4743_v54  ;;  %v4817_v41 = vld [vmem:[#allocation2 + $0x5e4] ss:$16 sps:$4 sm:$0xff]   ;;  %v4815_v43 = vld [vmem:[#allocation2 + $0x5e0] ss:$16 sps:$4 sm:$0xff]  }
  0x50   :  { %1523 = vmatpush2.bf16.msra.mxu1 %v4744_v55  ;;  %1483 = vmatprep.subr.bf16.mxu0 %v4745_v56  ;;  %v4824_v46 = vld [vmem:[#allocation2 + $0x5c4] ss:$16 sps:$4 sm:$0xff]   ;;  %v4822_v49 = vld [vmem:[#allocation2 + $0x5c0] ss:$16 sps:$4 sm:$0xff]   ;;  %v4831_v55 = vld [vmem:[#allocation2 + $0xa8] ss:$16 sps:$4 sm:$0xff]  }
  0x51   :  { %1524 = vmatprep.subr.bf16.mxu1 %v4747_v57  ;;  %v4830_v52 = vld [vmem:[#allocation2 + $0x5a4] ss:$16 sps:$4 sm:$0xff]   ;;  %v4828_v54 = vld [vmem:[#allocation2 + $0x5a0] ss:$16 sps:$4 sm:$0xff]   ;;  %v4839_v57 = vld [vmem:[#allocation2 + $0x8c] ss:$16 sps:$4 sm:$0xff]  }
  0x52   :  { %v4836_v56 = vld [vmem:[#allocation2 + $0x584] ss:$16 sps:$4 sm:$0xff]  }
  0x53   :  { %1484 = vmatpush2.bf16.msra.mxu0 %v4749_v58  ;;  %v4834_v58 = vld [vmem:[#allocation2 + $0x580] ss:$16 sps:$4 sm:$0xff]  }
  0x54   :  { %1525 = vmatpush2.bf16.msra.mxu1 %v4750_v59  ;;  %1485 = vmatprep.subr.bf16.mxu0 %v4751_v60  ;;  %v4837_v59 = vld [vmem:[#allocation2 + $0x88] ss:$16 sps:$4 sm:$0xff]   ;;  %v4842_v60 = vld [vmem:[#allocation2 + $0x564] ss:$16 sps:$4 sm:$0xff]  }
  0x55   :  { %1526 = vmatprep.subr.bf16.mxu1 %v4753_v61  ;;  %v4845_v61 = vld [vmem:[#allocation2 + $0x6c] ss:$16 sps:$4 sm:$0xff]  }
  0x57   :  { %1486 = vmatpush2.bf16.msra.mxu0 %v4755_v62  ;;  %v4840_v62 = vld [vmem:[#allocation2 + $0x560] ss:$16 sps:$4 sm:$0xff]  }
  0x58   :  { %1527 = vmatpush2.bf16.msra.mxu1 %v4756_v63  ;;  %1487 = vmatprep.subr.bf16.mxu0 %v4757_v0  ;;  %v4848_v63 = vld [vmem:[#allocation2 + $0x544] ss:$16 sps:$4 sm:$0xff]   ;;  %v4851_v0 = vld [vmem:[#allocation2 + $0x4c] ss:$16 sps:$4 sm:$0xff]  }
  0x59   :  { %1528 = vmatprep.subr.bf16.mxu1 %v4759_v1  ;;  %v4846_v1 = vld [vmem:[#allocation2 + $0x540] ss:$16 sps:$4 sm:$0xff]  }
  0x5b   :  { %1488 = vmatpush2.bf16.msra.mxu0 %v4761_v2  ;;  %v4849_v2 = vld [vmem:[#allocation2 + $0x48] ss:$16 sps:$4 sm:$0xff]  }
  0x5c   :  { %1529 = vmatpush2.bf16.msra.mxu1 %v4762_v3  ;;  %1539 = vmatprep.subr.bf16.mxu0 %v4769_v4  ;;  %v4854_v3 = vld [vmem:[#allocation2 + $0x524] ss:$16 sps:$4 sm:$0xff]   ;;  %v4857_v4 = vld [vmem:[#allocation2 + $0x2c] ss:$16 sps:$4 sm:$0xff]  }
  0x5d   :  { %1580 = vmatprep.subr.bf16.mxu1 %v4772_v5  ;;  %v4852_v5 = vld [vmem:[#allocation2 + $0x520] ss:$16 sps:$4 sm:$0xff]  }
  0x5e   :  { %1490 = vmatmul.mubr.bf16.vlgmr.msra.gmra.mxu0 %v5504_v6 }
  0x5f   :  { %1531 = vmatmul.mubr.bf16.vlgmr.msra.gmra.mxu1 %v5506_v7  ;;  %1540 = vmatpush1.bf16.msra.mxu0 %v4767_v8  ;;  %v4855_v8 = vld [vmem:[#allocation2 + $0x28] ss:$16 sps:$4 sm:$0xff]  }
  0x60   :  { %1581 = vmatpush1.bf16.msra.mxu1 %v4770_v9  ;;  %1541 = vmatprep.subr.bf16.mxu0 %v4775_v10  ;;  %v4860_v9 = vld [vmem:[#allocation2 + $0x504] ss:$16 sps:$4 sm:$0xff]   ;;  %v4863_v10 = vld [vmem:[#allocation2 + $0xc] ss:$16 sps:$4 sm:$0xff]  }
  0x61   :  { %1582 = vmatprep.subr.bf16.mxu1 %v4778_v11  ;;  %1612 = vmatprep.mubr.bf16.mxu1 %v5432_v16  ;;  %v4858_v11 = vld [vmem:[#allocation2 + $0x500] ss:$16 sps:$4 sm:$0xff]  }
  0x62   :  { %1571 = vmatprep.mubr.bf16.mxu0 %v5518_v35 }
  0x63   :  { %1542 = vmatpush1.bf16.msra.mxu0 %v4773_v12  ;;  %v4861_v12 = vld [vmem:[#allocation2 + $0x8] ss:$16 sps:$4 sm:$0xff]  }
  0x64   :  { %1583 = vmatpush1.bf16.msra.mxu1 %v4776_v13  ;;  %1543 = vmatprep.subr.bf16.mxu0 %v4781_v14  ;;  %v4868_v13 = vld [vmem:[#allocation2 + $0x1ec] ss:$16 sps:$4 sm:$0xff]  }
  0x65   :  { %1584 = vmatprep.subr.bf16.mxu1 %v4784_v15  ;;  %v4871_v14 = vld [vmem:[#allocation2 + $0x2ec] ss:$16 sps:$4 sm:$0xff]   ;;  %v5527_v15 = vcombine.low %v5514_v33, %v5514_v33  ;;  %v4890_v33 = vld [vmem:[#allocation2 + $0x168] ss:$16 sps:$4 sm:$0xff]  }
  0x67   :  { %1544 = vmatpush1.bf16.msra.mxu0 %v4779_v17  ;;  %v4866_v17 = vld [vmem:[#allocation2 + $0x1e8] ss:$16 sps:$4 sm:$0xff]  }
  0x68   :  { %1585 = vmatpush1.bf16.msra.mxu1 %v4782_v18  ;;  %1545 = vmatprep.subr.bf16.mxu0 %v4787_v19  ;;  %v4869_v18 = vld [vmem:[#allocation2 + $0x2e8] ss:$16 sps:$4 sm:$0xff]   ;;  %v4874_v19 = vld [vmem:[#allocation2 + $0x1cc] ss:$16 sps:$4 sm:$0xff]  }
  0x69   :  { %1586 = vmatprep.subr.bf16.mxu1 %v4790_v20  ;;  %v4877_v20 = vld [vmem:[#allocation2 + $0x2cc] ss:$16 sps:$4 sm:$0xff]  }
  0x6b   :  { %1546 = vmatpush1.bf16.msra.mxu0 %v4785_v21  ;;  %v4872_v21 = vld [vmem:[#allocation2 + $0x1c8] ss:$16 sps:$4 sm:$0xff]  }
  0x6c   :  { %1587 = vmatpush1.bf16.msra.mxu1 %v4788_v22  ;;  %1547 = vmatprep.subr.bf16.mxu0 %v4793_v23  ;;  %v4875_v22 = vld [vmem:[#allocation2 + $0x2c8] ss:$16 sps:$4 sm:$0xff]   ;;  %v4880_v23 = vld [vmem:[#allocation2 + $0x1ac] ss:$16 sps:$4 sm:$0xff]  }
  0x6d   :  { %1588 = vmatprep.subr.bf16.mxu1 %v4796_v24  ;;  %v4883_v24 = vld [vmem:[#allocation2 + $0x2ac] ss:$16 sps:$4 sm:$0xff]  }
  0x6f   :  { %1548 = vmatpush1.bf16.msra.mxu0 %v4791_v25  ;;  %v4878_v25 = vld [vmem:[#allocation2 + $0x1a8] ss:$16 sps:$4 sm:$0xff]  }
  0x70   :  { %1589 = vmatpush1.bf16.msra.mxu1 %v4794_v26  ;;  %1549 = vmatprep.subr.bf16.mxu0 %v4799_v27  ;;  %v4881_v26 = vld [vmem:[#allocation2 + $0x2a8] ss:$16 sps:$4 sm:$0xff]   ;;  %v4886_v27 = vld [vmem:[#allocation2 + $0x18c] ss:$16 sps:$4 sm:$0xff]  }
  0x71   :  { %1590 = vmatprep.subr.bf16.mxu1 %v4802_v28  ;;  %v4889_v28 = vld [vmem:[#allocation2 + $0x28c] ss:$16 sps:$4 sm:$0xff]  }
  0x73   :  { %1550 = vmatpush1.bf16.msra.mxu0 %v4797_v29  ;;  %v4884_v29 = vld [vmem:[#allocation2 + $0x188] ss:$16 sps:$4 sm:$0xff]  }
  0x74   :  { %1591 = vmatpush1.bf16.msra.mxu1 %v4800_v30  ;;  %1551 = vmatprep.subr.bf16.mxu0 %v4805_v31  ;;  %v4887_v30 = vld [vmem:[#allocation2 + $0x288] ss:$16 sps:$4 sm:$0xff]   ;;  %v4892_v31 = vld [vmem:[#allocation2 + $0x16c] ss:$16 sps:$4 sm:$0xff]  }
  0x75   :  { %1592 = vmatprep.subr.bf16.mxu1 %v4808_v32  ;;  %v4895_v32 = vld [vmem:[#allocation2 + $0x26c] ss:$16 sps:$4 sm:$0xff]  }
  0x77   :  { %1552 = vmatpush1.bf16.msra.mxu0 %v4803_v34  ;;  %v4898_v34 = vld [vmem:[#allocation2 + $0x14c] ss:$16 sps:$4 sm:$0xff]  }
  0x78   :  { %1593 = vmatpush1.bf16.msra.mxu1 %v4806_v36  ;;  %1553 = vmatprep.subr.bf16.mxu0 %v4811_v37  ;;  %v4901_v36 = vld [vmem:[#allocation2 + $0x24c] ss:$16 sps:$4 sm:$0xff]   ;;  %v4896_v37 = vld [vmem:[#allocation2 + $0x148] ss:$16 sps:$4 sm:$0xff]  }
  0x79   :  { %1594 = vmatprep.subr.bf16.mxu1 %v4814_v38  ;;  %v4899_v38 = vld [vmem:[#allocation2 + $0x248] ss:$16 sps:$4 sm:$0xff]  }
  0x7b   :  { %1554 = vmatpush1.bf16.msra.mxu0 %v4809_v39  ;;  %v4904_v39 = vld [vmem:[#allocation2 + $0x12c] ss:$16 sps:$4 sm:$0xff]  }
  0x7c   :  { %1595 = vmatpush1.bf16.msra.mxu1 %v4812_v40  ;;  %1555 = vmatprep.subr.bf16.mxu0 %v4817_v41  ;;  %v4907_v40 = vld [vmem:[#allocation2 + $0x22c] ss:$16 sps:$4 sm:$0xff]   ;;  %v4902_v41 = vld [vmem:[#allocation2 + $0x128] ss:$16 sps:$4 sm:$0xff]  }
  0x7d   :  { %1621 = vmatprep.subr.bf16.mxu1 %v4821_v42  ;;  %v4905_v42 = vld [vmem:[#allocation2 + $0x228] ss:$16 sps:$4 sm:$0xff]  }
  0x7f   :  { %1613 = vmatmul.mubr.bf16.vlgmr.msra.gmra.mxu1 %v4818_v44  ;;  %1556 = vmatpush2.bf16.msra.mxu0 %v4815_v43  ;;  %v4910_v43 = vld [vmem:[#allocation2 + $0x10c] ss:$16 sps:$4 sm:$0xff]  }
  0x80   :  { %1622 = vmatpush1.bf16.msra.mxu1 %v4819_v45  ;;  %1557 = vmatprep.subr.bf16.mxu0 %v4824_v46  ;;  %v4913_v44 = vld [vmem:[#allocation2 + $0x20c] ss:$16 sps:$4 sm:$0xff]   ;;  %v4908_v45 = vld [vmem:[#allocation2 + $0x108] ss:$16 sps:$4 sm:$0xff]  }
  0x81   :  { %1623 = vmatprep.subr.bf16.mxu1 %v4827_v48  ;;  %1653 = vmatprep.mubr.bf16.mxu1 %v5495_v47  ;;  %v4843_v47 = vld [vmem:[#allocation2 + $0x68] ss:$16 sps:$4 sm:$0xff]   ;;  %v4916_v48 = vld [vmem:[#allocation2 + $0x3ec] ss:$16 sps:$4 sm:$0xff]  }
  0x82   :  { %v4911_v46 = vld [vmem:[#allocation2 + $0x208] ss:$16 sps:$4 sm:$0xff]  }
  0x83   :  { %1558 = vmatpush2.bf16.msra.mxu0 %v4822_v49  ;;  %v4919_v49 = vld [vmem:[#allocation2 + $0x4ec] ss:$16 sps:$4 sm:$0xff]  }
  0x84   :  { %1624 = vmatpush1.bf16.msra.mxu1 %v4825_v50  ;;  %1559 = vmatprep.subr.bf16.mxu0 %v4830_v52  ;;  %v4914_v50 = vld [vmem:[#allocation2 + $0x3e8] ss:$16 sps:$4 sm:$0xff]  }
  0x85   :  { %1625 = vmatprep.subr.bf16.mxu1 %v4833_v53  ;;  %v4917_v52 = vld [vmem:[#allocation2 + $0x4e8] ss:$16 sps:$4 sm:$0xff]   ;;  %v4922_v53 = vld [vmem:[#allocation2 + $0x3cc] ss:$16 sps:$4 sm:$0xff]  }
  0x87   :  { %1560 = vmatpush2.bf16.msra.mxu0 %v4828_v54  ;;  %v4925_v54 = vld [vmem:[#allocation2 + $0x4cc] ss:$16 sps:$4 sm:$0xff]  }
  0x88   :  { %1626 = vmatpush1.bf16.msra.mxu1 %v4831_v55  ;;  %1561 = vmatprep.subr.bf16.mxu0 %v4836_v56  ;;  %v4920_v55 = vld [vmem:[#allocation2 + $0x3c8] ss:$16 sps:$4 sm:$0xff]  }
  0x89   :  { %1627 = vmatprep.subr.bf16.mxu1 %v4839_v57  ;;  %v4923_v56 = vld [vmem:[#allocation2 + $0x4c8] ss:$16 sps:$4 sm:$0xff]   ;;  %v4928_v57 = vld [vmem:[#allocation2 + $0x3ac] ss:$16 sps:$4 sm:$0xff]  }
  0x8b   :  { %1562 = vmatpush2.bf16.msra.mxu0 %v4834_v58  ;;  %v4931_v58 = vld [vmem:[#allocation2 + $0x4ac] ss:$16 sps:$4 sm:$0xff]  }
  0x8c   :  { %1628 = vmatpush1.bf16.msra.mxu1 %v4837_v59  ;;  %1563 = vmatprep.subr.bf16.mxu0 %v4842_v60  ;;  %v4926_v59 = vld [vmem:[#allocation2 + $0x3a8] ss:$16 sps:$4 sm:$0xff]  }
  0x8d   :  { %1629 = vmatprep.subr.bf16.mxu1 %v4845_v61  ;;  %v4929_v60 = vld [vmem:[#allocation2 + $0x4a8] ss:$16 sps:$4 sm:$0xff]   ;;  %v4934_v61 = vld [vmem:[#allocation2 + $0x38c] ss:$16 sps:$4 sm:$0xff]  }
  0x8f   :  { %1564 = vmatpush2.bf16.msra.mxu0 %v4840_v62  ;;  %v4937_v62 = vld [vmem:[#allocation2 + $0x48c] ss:$16 sps:$4 sm:$0xff]  }
  0x90   :  { %1630 = vmatpush1.bf16.msra.mxu1 %v4843_v47  ;;  %1565 = vmatprep.subr.bf16.mxu0 %v4848_v63  ;;  %v4932_v47 = vld [vmem:[#allocation2 + $0x388] ss:$16 sps:$4 sm:$0xff]   ;;  %v4940_v63 = vld [vmem:[#allocation2 + $0x36c] ss:$16 sps:$4 sm:$0xff]  }
  0x91   :  { %1631 = vmatprep.subr.bf16.mxu1 %v4851_v0  ;;  %v4943_v0 = vld [vmem:[#allocation2 + $0x46c] ss:$16 sps:$4 sm:$0xff]  }
  0x93   :  { %1566 = vmatpush2.bf16.msra.mxu0 %v4846_v1  ;;  %v4938_v1 = vld [vmem:[#allocation2 + $0x368] ss:$16 sps:$4 sm:$0xff]  }
  0x94   :  { %1632 = vmatpush1.bf16.msra.mxu1 %v4849_v2  ;;  %1567 = vmatprep.subr.bf16.mxu0 %v4854_v3  ;;  %v4941_v2 = vld [vmem:[#allocation2 + $0x468] ss:$16 sps:$4 sm:$0xff]   ;;  %v4946_v3 = vld [vmem:[#allocation2 + $0x34c] ss:$16 sps:$4 sm:$0xff]  }
  0x95   :  { %1633 = vmatprep.subr.bf16.mxu1 %v4857_v4  ;;  %v4944_v4 = vld [vmem:[#allocation2 + $0x348] ss:$16 sps:$4 sm:$0xff]  }
  0x97   :  { %1568 = vmatpush2.bf16.msra.mxu0 %v4852_v5  ;;  %v4947_v5 = vld [vmem:[#allocation2 + $0x448] ss:$16 sps:$4 sm:$0xff]  }
  0x98   :  { %1634 = vmatpush1.bf16.msra.mxu1 %v4855_v8  ;;  %1569 = vmatprep.subr.bf16.mxu0 %v4860_v9  ;;  %v4952_v8 = vld [vmem:[#allocation2 + $0x32c] ss:$16 sps:$4 sm:$0xff]  }
  0x99   :  { %1635 = vmatprep.subr.bf16.mxu1 %v4863_v10  ;;  %v4955_v9 = vld [vmem:[#allocation2 + $0x42c] ss:$16 sps:$4 sm:$0xff]   ;;  %v4950_v10 = vld [vmem:[#allocation2 + $0x328] ss:$16 sps:$4 sm:$0xff]  }
  0x9b   :  { %1570 = vmatpush2.bf16.msra.mxu0 %v4858_v11  ;;  %v4953_v11 = vld [vmem:[#allocation2 + $0x428] ss:$16 sps:$4 sm:$0xff]  }
  0x9c   :  { %1636 = vmatpush1.bf16.msra.mxu1 %v4861_v12  ;;  %1662 = vmatprep.subr.bf16.mxu0 %v4871_v14  ;;  %v4958_v12 = vld [vmem:[#allocation2 + $0x30c] ss:$16 sps:$4 sm:$0xff]   ;;  %v4956_v14 = vld [vmem:[#allocation2 + $0x308] ss:$16 sps:$4 sm:$0xff]  }
  0x9d   :  { %1637 = vmatprep.subr.bf16.mxu1 %v4868_v13  ;;  %v4961_v13 = vld [vmem:[#allocation2 + $0x40c] ss:$16 sps:$4 sm:$0xff]  }
  0x9e   :  { %1572 = vmatmul.mubr.bf16.vlgmr.msra.gmra.mxu0 %v5527_v15 }
  0x9f   :  { %1663 = vmatpush1.bf16.msra.mxu0 %v4869_v18  ;;  %1694 = vmatprep.mubr.bf16.mxu0 %v5500_v51  ;;  %v4893_v51 = vld [vmem:[#allocation2 + $0x268] ss:$16 sps:$4 sm:$0xff]   ;;  %v4964_v18 = vld [vmem:[#allocation2 + $0x5ec] ss:$16 sps:$4 sm:$0xff]  }
  0xa0   :  { %1638 = vmatpush2.bf16.msra.mxu1 %v4866_v17  ;;  %1664 = vmatprep.subr.bf16.mxu0 %v4877_v20  ;;  %v4959_v17 = vld [vmem:[#allocation2 + $0x408] ss:$16 sps:$4 sm:$0xff]  }
  0xa1   :  { %1639 = vmatprep.subr.bf16.mxu1 %v4874_v19  ;;  %v4967_v19 = vld [vmem:[#allocation2 + $0x6ec] ss:$16 sps:$4 sm:$0xff]   ;;  %v4962_v20 = vld [vmem:[#allocation2 + $0x5e8] ss:$16 sps:$4 sm:$0xff]  }
  0xa3   :  { %1665 = vmatpush1.bf16.msra.mxu0 %v4875_v22  ;;  %v4970_v22 = vld [vmem:[#allocation2 + $0x5cc] ss:$16 sps:$4 sm:$0xff]  }
  0xa4   :  { %1640 = vmatpush2.bf16.msra.mxu1 %v4872_v21  ;;  %1666 = vmatprep.subr.bf16.mxu0 %v4883_v24  ;;  %v4965_v21 = vld [vmem:[#allocation2 + $0x6e8] ss:$16 sps:$4 sm:$0xff]  }
  0xa5   :  { %1641 = vmatprep.subr.bf16.mxu1 %v4880_v23  ;;  %v4973_v23 = vld [vmem:[#allocation2 + $0x6cc] ss:$16 sps:$4 sm:$0xff]   ;;  %v4968_v24 = vld [vmem:[#allocation2 + $0x5c8] ss:$16 sps:$4 sm:$0xff]  }
  0xa7   :  { %1667 = vmatpush1.bf16.msra.mxu0 %v4881_v26  ;;  %v4976_v26 = vld [vmem:[#allocation2 + $0x5ac] ss:$16 sps:$4 sm:$0xff]  }
  0xa8   :  { %1642 = vmatpush2.bf16.msra.mxu1 %v4878_v25  ;;  %1668 = vmatprep.subr.bf16.mxu0 %v4889_v28  ;;  %v4971_v25 = vld [vmem:[#allocation2 + $0x6c8] ss:$16 sps:$4 sm:$0xff]  }
  0xa9   :  { %1643 = vmatprep.subr.bf16.mxu1 %v4886_v27  ;;  %v4979_v27 = vld [vmem:[#allocation2 + $0x6ac] ss:$16 sps:$4 sm:$0xff]   ;;  %v4974_v28 = vld [vmem:[#allocation2 + $0x5a8] ss:$16 sps:$4 sm:$0xff]  }
  0xab   :  { %1669 = vmatpush1.bf16.msra.mxu0 %v4887_v30  ;;  %v4982_v30 = vld [vmem:[#allocation2 + $0x58c] ss:$16 sps:$4 sm:$0xff]  }
  0xac   :  { %1644 = vmatpush2.bf16.msra.mxu1 %v4884_v29  ;;  %1670 = vmatprep.subr.bf16.mxu0 %v4895_v32  ;;  %v4977_v29 = vld [vmem:[#allocation2 + $0x6a8] ss:$16 sps:$4 sm:$0xff]  }
  0xad   :  { %1645 = vmatprep.subr.bf16.mxu1 %v4892_v31  ;;  %v4985_v31 = vld [vmem:[#allocation2 + $0x68c] ss:$16 sps:$4 sm:$0xff]   ;;  %v4980_v32 = vld [vmem:[#allocation2 + $0x588] ss:$16 sps:$4 sm:$0xff]  }
  0xaf   :  { %1671 = vmatpush1.bf16.msra.mxu0 %v4893_v51  ;;  %v4991_v51 = vld [vmem:[#allocation2 + $0x66c] ss:$16 sps:$4 sm:$0xff]  }
  0xb0   :  { %1646 = vmatpush2.bf16.msra.mxu1 %v4890_v33  ;;  %1672 = vmatprep.subr.bf16.mxu0 %v4901_v36  ;;  %v4983_v33 = vld [vmem:[#allocation2 + $0x688] ss:$16 sps:$4 sm:$0xff]  }
  0xb1   :  { %1647 = vmatprep.subr.bf16.mxu1 %v4898_v34  ;;  %v4986_v34 = vld [vmem:[#allocation2 + $0x568] ss:$16 sps:$4 sm:$0xff]  }
  0xb2   :  { %v4989_v36 = vld [vmem:[#allocation2 + $0x668] ss:$16 sps:$4 sm:$0xff]  }
  0xb3   :  { %1673 = vmatpush1.bf16.msra.mxu0 %v4899_v38  ;;  %v4997_v38 = vld [vmem:[#allocation2 + $0x64c] ss:$16 sps:$4 sm:$0xff]  }
  0xb4   :  { %1648 = vmatpush2.bf16.msra.mxu1 %v4896_v37  ;;  %1674 = vmatprep.subr.bf16.mxu0 %v4907_v40  ;;  %v4994_v37 = vld [vmem:[#allocation2 + $0x54c] ss:$16 sps:$4 sm:$0xff]  }
  0xb5   :  { %1649 = vmatprep.subr.bf16.mxu1 %v4904_v39  ;;  %v4995_v39 = vld [vmem:[#allocation2 + $0x648] ss:$16 sps:$4 sm:$0xff]   ;;  %v5000_v40 = vld [vmem:[#allocation2 + $0x52c] ss:$16 sps:$4 sm:$0xff]  }
  0xb7   :  { %1675 = vmatpush1.bf16.msra.mxu0 %v4905_v42  ;;  %v4998_v42 = vld [vmem:[#allocation2 + $0x528] ss:$16 sps:$4 sm:$0xff]  }
  0xb8   :  { %1650 = vmatpush2.bf16.msra.mxu1 %v4902_v41  ;;  %1676 = vmatprep.subr.bf16.mxu0 %v4913_v44  ;;  %v5003_v41 = vld [vmem:[#allocation2 + $0x62c] ss:$16 sps:$4 sm:$0xff]  }
  0xb9   :  { %1651 = vmatprep.subr.bf16.mxu1 %v4910_v43  ;;  %v5001_v43 = vld [vmem:[#allocation2 + $0x628] ss:$16 sps:$4 sm:$0xff]   ;;  %v5006_v44 = vld [vmem:[#allocation2 + $0x50c] ss:$16 sps:$4 sm:$0xff]  }
  0xbb   :  { %1677 = vmatpush1.bf16.msra.mxu0 %v4911_v46  ;;  %v5004_v46 = vld [vmem:[#allocation2 + $0x508] ss:$16 sps:$4 sm:$0xff]  }
  0xbc   :  { %1652 = vmatpush2.bf16.msra.mxu1 %v4908_v45  ;;  %1678 = vmatprep.subr.bf16.mxu0 %v4916_v48  ;;  %v5009_v45 = vld [vmem:[#allocation2 + $0x60c] ss:$16 sps:$4 sm:$0xff]   ;;  %v5007_v48 = vld [vmem:[#allocation2 + $0x608] ss:$16 sps:$4 sm:$0xff]  }
  0xbd   :  { %1703 = vmatprep.subr.bf16.mxu1 %v4919_v49  ;;  %v1820_v49 = vld [vmem:[%s5827_s3 + $0xf8] sm:$0xff] }
  0xbf   :  { %1654 = vmatmul.mubr.bf16.vlgmr.msra.gmra.mxu1 %v5504_v6  ;;  %1679 = vmatpush2.bf16.msra.mxu0 %v4914_v50  ;;  %v4935_v6 = vld [vmem:[#allocation2 + $0x488] ss:$16 sps:$4 sm:$0xff]  }
  0xc0   :  { %1704 = vmatpush1.bf16.msra.mxu1 %v4917_v52  ;;  %1680 = vmatprep.subr.bf16.mxu0 %v4922_v53  ;;  %v1804_v50 = vld [vmem:[%s5827_s3 + $0x78] sm:$0xff]  ;;  %v1819_v52 = vld [vmem:[%s5827_s3 + $0xf0] sm:$0xff] }
  0xc1   :  { %1705 = vmatprep.subr.bf16.mxu1 %v4925_v54  ;;  %1735 = vmatprep.mubr.bf16.mxu1 %v5518_v35  ;;  %v4949_v35 = vld [vmem:[#allocation2 + $0x44c] ss:$16 sps:$4 sm:$0xff]   ;;  %v1803_v53 = vld [vmem:[%s5827_s3 + $0x70] sm:$0xff] }
  0xc2   :  { %v1818_v54 = vld [vmem:[%s5827_s3 + $0xe8] sm:$0xff] }
  0xc3   :  { %1681 = vmatpush2.bf16.msra.mxu0 %v4920_v55  ;;  %v5359_v55 = vld [vmem:[%s5824_s0 + $0x18] ss:$0 sps:$4 sm:$0xff]  }
  0xc4   :  { %1706 = vmatpush1.bf16.msra.mxu1 %v4923_v56  ;;  %1682 = vmatprep.subr.bf16.mxu0 %v4928_v57  ;;  %v1802_v56 = vld [vmem:[%s5827_s3 + $0x68] sm:$0xff]  ;;  %v1817_v57 = vld [vmem:[%s5827_s3 + $0xe0] sm:$0xff] }
  0xc5   :  { %1707 = vmatprep.subr.bf16.mxu1 %v4931_v58  ;;  %v1801_v58 = vld [vmem:[%s5827_s3 + $0x60] sm:$0xff] }
  0xc7   :  { %1683 = vmatpush2.bf16.msra.mxu0 %v4926_v59  ;;  %v1800_v59 = vld [vmem:[%s5827_s3 + $0x58] sm:$0xff] }
  0xc8   :  { %1708 = vmatpush1.bf16.msra.mxu1 %v4929_v60  ;;  %1684 = vmatprep.subr.bf16.mxu0 %v4934_v61  ;;  %v1815_v60 = vld [vmem:[%s5827_s3 + $0xd0] sm:$0xff] }
  0xc9   :  { %1709 = vmatprep.subr.bf16.mxu1 %v4937_v62  ;;  %v1799_v61 = vld [vmem:[%s5827_s3 + $0x50] sm:$0xff]  ;;  %v1814_v62 = vld [vmem:[%s5827_s3 + $0xc8] sm:$0xff] }
  0xcb   :  { %1685 = vmatpush2.bf16.msra.mxu0 %v4932_v47  ;;  %v1798_v47 = vld [vmem:[%s5827_s3 + $0x48] sm:$0xff] }
  0xcc   :  { %1710 = vmatpush1.bf16.msra.mxu1 %v4935_v6  ;;  %1686 = vmatprep.subr.bf16.mxu0 %v4940_v63  ;;  %v1813_v6 = vld [vmem:[%s5827_s3 + $0xc0] sm:$0xff] }
  0xcd   :  { %1711 = vmatprep.subr.bf16.mxu1 %v4943_v0  ;;  %v1797_v63 = vld [vmem:[%s5827_s3 + $0x40] sm:$0xff]  ;;  %v1812_v0 = vld [vmem:[%s5827_s3 + $0xb8] sm:$0xff] }
  0xcf   :  { %1687 = vmatpush2.bf16.msra.mxu0 %v4938_v1  ;;  %v1796_v1 = vld [vmem:[%s5827_s3 + $0x38] sm:$0xff] }
  0xd0   :  { %1712 = vmatpush1.bf16.msra.mxu1 %v4941_v2  ;;  %1688 = vmatprep.subr.bf16.mxu0 %v4946_v3  ;;  %v1811_v2 = vld [vmem:[%s5827_s3 + $0xb0] sm:$0xff] }
  0xd1   :  { %1713 = vmatprep.subr.bf16.mxu1 %v4949_v35  ;;  %v1795_v3 = vld [vmem:[%s5827_s3 + $0x30] sm:$0xff]  ;;  %v1810_v35 = vld [vmem:[%s5827_s3 + $0xa8] sm:$0xff] }
  0xd3   :  { %1689 = vmatpush2.bf16.msra.mxu0 %v4944_v4  ;;  %v1794_v4 = vld [vmem:[%s5827_s3 + $0x28] sm:$0xff] }
  0xd4   :  { %1714 = vmatpush1.bf16.msra.mxu1 %v4947_v5  ;;  %1690 = vmatprep.subr.bf16.mxu0 %v4952_v8  ;;  %v1809_v5 = vld [vmem:[%s5827_s3 + $0xa0] sm:$0xff] }
  0xd5   :  { %1715 = vmatprep.subr.bf16.mxu1 %v4955_v9  ;;  %v1793_v8 = vld [vmem:[%s5827_s3 + $0x20] sm:$0xff]  ;;  %v1808_v9 = vld [vmem:[%s5827_s3 + $0x98] sm:$0xff] }
  0xd7   :  { %1691 = vmatpush2.bf16.msra.mxu0 %v4950_v10  ;;  %v1792_v10 = vld [vmem:[%s5827_s3 + $0x18] sm:$0xff] }
  0xd8   :  { %1716 = vmatpush1.bf16.msra.mxu1 %v4953_v11  ;;  %1692 = vmatprep.subr.bf16.mxu0 %v4958_v12  ;;  %v1807_v11 = vld [vmem:[%s5827_s3 + $0x90] sm:$0xff] }
  0xd9   :  { %1717 = vmatprep.subr.bf16.mxu1 %v4961_v13  ;;  %v1791_v12 = vld [vmem:[%s5827_s3 + $0x10] sm:$0xff]  ;;  %v1806_v13 = vld [vmem:[%s5827_s3 + $0x88] sm:$0xff] }
  0xdb   :  { %1693 = vmatpush2.bf16.msra.mxu0 %v4956_v14  ;;  %v1790_v14 = vld [vmem:[%s5827_s3 + $0x8] sm:$0xff] }
  0xdc   :  { %1718 = vmatpush1.bf16.msra.mxu1 %v4959_v17  ;;  %1744 = vmatprep.subr.bf16.mxu0 %v4967_v19  ;;  %v1805_v17 = vld [vmem:[%s5827_s3 + $0x80] sm:$0xff] }
  0xdd   :  { %1719 = vmatprep.subr.bf16.mxu1 %v4964_v18  ;;  %v1789_v18 = vld [vmem:[%s5827_s3] sm:$0xff] }
  0xde   :  { %1695 = vmatmul.mubr.bf16.vlgmr.msra.gmra.mxu0 %v5506_v7  ;;  %v4988_v7 = vld [vmem:[#allocation2 + $0x56c] ss:$16 sps:$4 sm:$0xff]  }
  0xdf   :  { %1745 = vmatpush1.bf16.msra.mxu0 %v4965_v21  ;;  %1776 = vmatprep.mubr.bf16.mxu0 %v5432_v16  ;;  %v4992_v16 = vld [vmem:[#allocation2 + $0x548] ss:$16 sps:$4 sm:$0xff]  }
  0xe0   :  { %1720 = vmatpush2.bf16.msra.mxu1 %v4962_v20  ;;  %1746 = vmatprep.subr.bf16.mxu0 %v4973_v23 }
  0xe1   :  { %1721 = vmatprep.subr.bf16.mxu1 %v4970_v22 }
  0xe3   :  { %1747 = vmatpush1.bf16.msra.mxu0 %v4971_v25 }
  0xe4   :  { %1722 = vmatpush2.bf16.msra.mxu1 %v4968_v24  ;;  %1748 = vmatprep.subr.bf16.mxu0 %v4979_v27  ;;  %v1852_v27 = vld [vmem:[%s5827_s3 + $0x1f8] sm:$0xff] }
  0xe5   :  { %1723 = vmatprep.subr.bf16.mxu1 %v4976_v26 }
  0xe7   :  { %1749 = vmatpush1.bf16.msra.mxu0 %v4977_v29  ;;  %v1851_v29 = vld [vmem:[%s5827_s3 + $0x1f0] sm:$0xff] }
  0xe8   :  { %1724 = vmatpush2.bf16.msra.mxu1 %v4974_v28  ;;  %1750 = vmatprep.subr.bf16.mxu0 %v4985_v31  ;;  %v1836_v28 = vld [vmem:[%s5827_s3 + $0x178] sm:$0xff]  ;;  %v1850_v31 = vld [vmem:[%s5827_s3 + $0x1e8] sm:$0xff] }
  0xe9   :  { %1725 = vmatprep.subr.bf16.mxu1 %v4982_v30  ;;  %v1835_v30 = vld [vmem:[%s5827_s3 + $0x170] sm:$0xff] }
  0xeb   :  { %1751 = vmatpush1.bf16.msra.mxu0 %v4983_v33  ;;  %v1849_v33 = vld [vmem:[%s5827_s3 + $0x1e0] sm:$0xff] }
  0xec   :  { %1726 = vmatpush2.bf16.msra.mxu1 %v4980_v32  ;;  %1752 = vmatprep.subr.bf16.mxu0 %v4991_v51  ;;  %v1834_v32 = vld [vmem:[%s5827_s3 + $0x168] sm:$0xff]  ;;  %v1848_v51 = vld [vmem:[%s5827_s3 + $0x1d8] sm:$0xff] }
  0xed   :  { %1727 = vmatprep.subr.bf16.mxu1 %v4988_v7  ;;  %v1833_v7 = vld [vmem:[%s5827_s3 + $0x160] sm:$0xff] }
  0xef   :  { %1753 = vmatpush1.bf16.msra.mxu0 %v4989_v36  ;;  %v1847_v36 = vld [vmem:[%s5827_s3 + $0x1d0] sm:$0xff] }
  0xf0   :  { %1728 = vmatpush2.bf16.msra.mxu1 %v4986_v34  ;;  %1754 = vmatprep.subr.bf16.mxu0 %v4997_v38  ;;  %v1832_v34 = vld [vmem:[%s5827_s3 + $0x158] sm:$0xff]  ;;  %v1846_v38 = vld [vmem:[%s5827_s3 + $0x1c8] sm:$0xff] }
  0xf1   :  { %1729 = vmatprep.subr.bf16.mxu1 %v4994_v37  ;;  %v1831_v37 = vld [vmem:[%s5827_s3 + $0x150] sm:$0xff] }
  0xf3   :  { %1755 = vmatpush1.bf16.msra.mxu0 %v4995_v39  ;;  %v1845_v39 = vld [vmem:[%s5827_s3 + $0x1c0] sm:$0xff] }
  0xf4   :  { %1730 = vmatpush2.bf16.msra.mxu1 %v4992_v16  ;;  %1756 = vmatprep.subr.bf16.mxu0 %v5003_v41  ;;  %v1830_v16 = vld [vmem:[%s5827_s3 + $0x148] sm:$0xff]  ;;  %v1844_v41 = vld [vmem:[%s5827_s3 + $0x1b8] sm:$0xff] }
  0xf5   :  { %1731 = vmatprep.subr.bf16.mxu1 %v5000_v40  ;;  %v1829_v40 = vld [vmem:[%s5827_s3 + $0x140] sm:$0xff] }
  0xf7   :  { %1757 = vmatpush1.bf16.msra.mxu0 %v5001_v43  ;;  %v1843_v43 = vld [vmem:[%s5827_s3 + $0x1b0] sm:$0xff] }
  0xf8   :  { %1732 = vmatpush2.bf16.msra.mxu1 %v4998_v42  ;;  %1758 = vmatprep.subr.bf16.mxu0 %v5009_v45  ;;  %v1828_v42 = vld [vmem:[%s5827_s3 + $0x138] sm:$0xff]  ;;  %v1842_v45 = vld [vmem:[%s5827_s3 + $0x1a8] sm:$0xff] }
  0xf9   :  { %1733 = vmatprep.subr.bf16.mxu1 %v5006_v44  ;;  %v1827_v44 = vld [vmem:[%s5827_s3 + $0x130] sm:$0xff] }
  0xfb   :  { %1759 = vmatpush1.bf16.msra.mxu0 %v5007_v48  ;;  %v1841_v48 = vld [vmem:[%s5827_s3 + $0x1a0] sm:$0xff] }
  0xfc   :  { %1734 = vmatpush2.bf16.msra.mxu1 %v5004_v46  ;;  %4543 = vmatprep.subr.mxu0 %v1820_v49  ;;  %v1826_v46 = vld [vmem:[%s5827_s3 + $0x128] sm:$0xff] }
  0xfd   :  { %4578 = vmatprep.subr.mxu1 %v1852_v27 }
  0xfe   :  { %1777 = vmatmul.mubr.bf16.vlgmr.msra.gmra.mxu0 %v5359_v55  ;;  %v1839_v55 = vld [vmem:[%s5827_s3 + $0x190] sm:$0xff] }
  0xff   :  { %1736 = vmatmul.mubr.bf16.vlgmr.msra.gmra.mxu1 %v5527_v15  ;;  %4544 = vmatpush3.msra.mxu0 %v1804_v50  ;;  %v1816_v15 = vld [vmem:[%s5827_s3 + $0xd8] sm:$0xff]  ;;  %v1825_v50 = vld [vmem:[%s5827_s3 + $0x120] sm:$0xff] }
 0x100   :  { %4545 = vmatprep.subr.mxu0 %v1819_v52  ;;  %4579 = vmatpush3.msra.mxu1 %v1836_v28  ;;  %v1840_v52 = vld [vmem:[%s5827_s3 + $0x198] sm:$0xff] }
 0x101   :  { %4546 = vmatpush3.msra.mxu0 %v1803_v53  ;;  %4580 = vmatprep.subr.mxu1 %v1851_v29 }
 0x102   :  { %4547 = vmatprep.subr.mxu0 %v1818_v54  ;;  %4581 = vmatpush3.msra.mxu1 %v1835_v30  ;;  %v1824_v54 = vld [vmem:[%s5827_s3 + $0x118] sm:$0xff] }
 0x103   :  { %4548 = vmatpush3.msra.mxu0 %v1802_v56  ;;  %4582 = vmatprep.subr.mxu1 %v1850_v31 }
 0x104   :  { %4549 = vmatprep.subr.mxu0 %v1817_v57  ;;  %4583 = vmatpush3.msra.mxu1 %v1834_v32  ;;  %v1823_v57 = vld [vmem:[%s5827_s3 + $0x110] sm:$0xff] }
 0x105   :  { %4550 = vmatpush3.msra.mxu0 %v1801_v58  ;;  %4584 = vmatprep.subr.mxu1 %v1849_v33  ;;  %v1838_v58 = vld [vmem:[%s5827_s3 + $0x188] sm:$0xff] }
 0x106   :  { %4551 = vmatprep.subr.mxu0 %v1816_v15  ;;  %4585 = vmatpush3.msra.mxu1 %v1833_v7 }
 0x107   :  { %4552 = vmatpush3.msra.mxu0 %v1800_v59  ;;  %4586 = vmatprep.subr.mxu1 %v1848_v51  ;;  %v1822_v59 = vld [vmem:[%s5827_s3 + $0x108] sm:$0xff] }
 0x108   :  { %4553 = vmatprep.subr.mxu0 %v1815_v60  ;;  %4587 = vmatpush3.msra.mxu1 %v1832_v34  ;;  %v1837_v60 = vld [vmem:[%s5827_s3 + $0x180] sm:$0xff] }
 0x109   :  { %4554 = vmatpush3.msra.mxu0 %v1799_v61  ;;  %4588 = vmatprep.subr.mxu1 %v1847_v36  ;;  %v1821_v61 = vld [vmem:[%s5827_s3 + $0x100] sm:$0xff] }
 0x10a   :  { %4555 = vmatprep.subr.mxu0 %v1814_v62  ;;  %4589 = vmatpush3.msra.mxu1 %v1831_v37  ;;  %v292_v62 = vlaneseq }
 0x10b   :  { %4556 = vmatpush3.msra.mxu0 %v1798_v47  ;;  %4590 = vmatprep.subr.mxu1 %v1846_v38 }
 0x10c   :  { %4557 = vmatprep.subr.mxu0 %v1813_v6  ;;  %4591 = vmatpush3.msra.mxu1 %v1830_v16  ;;  %v5739_v47 = vshrl.u32 %v292_v62, 7 }
 0x10d   :  { %4558 = vmatpush3.msra.mxu0 %v1797_v63  ;;  %4592 = vmatprep.subr.mxu1 %v1845_v39  ;;  %v290_v63 = vld [vmem:[%s5826_s2] sm:$0xf] }
 0x10e   :  { %4559 = vmatprep.subr.mxu0 %v1812_v0  ;;  %4593 = vmatpush3.msra.mxu1 %v1829_v40  ;;  %v5742_v6 = vsub.s32 0, %v5739_v47  ;;  %v5748_v0 = vsub.s32 1, %v5739_v47  ;;  %v5760_v29 = vsub.s32 3, %v5739_v47 }
 0x10f   :  { %4560 = vmatpush3.msra.mxu0 %v1796_v1  ;;  %4594 = vmatprep.subr.mxu1 %v1844_v41 }
 0x110   :  { %4561 = vmatprep.subr.mxu0 %v1811_v2  ;;  %4595 = vmatpush3.msra.mxu1 %v1828_v42  ;;  %v295_v1 = vrot.slane %v290_v63, %v5742_v6  ;;  %v299_v2 = vrot.slane %v290_v63, %v5748_v0  ;;  %v307_v31 = vrot.slane %v290_v63, %v5760_v29 }
 0x111   :  { %4562 = vmatpush3.msra.mxu0 %v1795_v3  ;;  %4596 = vmatprep.subr.mxu1 %v1843_v43 }
 0x112   :  { %4563 = vmatprep.subr.mxu0 %v1810_v35  ;;  %4597 = vmatpush3.msra.mxu1 %v1827_v44 }
 0x113   :  { %4564 = vmatpush3.msra.mxu0 %v1794_v4  ;;  %4598 = vmatprep.subr.mxu1 %v1842_v45 }
 0x114   :  { %4565 = vmatprep.subr.mxu0 %v1809_v5  ;;  %4599 = vmatpush3.msra.mxu1 %v1826_v46 }
 0x115   :  { %4566 = vmatpush3.msra.mxu0 %v1793_v8  ;;  %4600 = vmatprep.subr.mxu1 %v1841_v48 }
 0x116   :  { %4567 = vmatprep.subr.mxu0 %v1808_v9  ;;  %4601 = vmatpush3.msra.mxu1 %v1825_v50 }
 0x117   :  { %4568 = vmatpush3.msra.mxu0 %v1792_v10  ;;  %4602 = vmatprep.subr.mxu1 %v1840_v52 }
 0x118   :  { %4569 = vmatprep.subr.mxu0 %v1807_v11  ;;  %4603 = vmatpush3.msra.mxu1 %v1824_v54 }
 0x119   :  { %4570 = vmatpush3.msra.mxu0 %v1791_v12  ;;  %4604 = vmatprep.subr.mxu1 %v1839_v55 }
 0x11a   :  { %4571 = vmatprep.subr.mxu0 %v1806_v13  ;;  %4605 = vmatpush3.msra.mxu1 %v1823_v57 }
 0x11b   :  { %4572 = vmatpush3.msra.mxu0 %v1790_v14  ;;  %4606 = vmatprep.subr.mxu1 %v1838_v58 }
 0x11c   :  { %4573 = vmatprep.subr.mxu0 %v1805_v17  ;;  %4607 = vmatpush3.msra.mxu1 %v1822_v59  ;;  %v5434_v59 = vmov 0.0  }
 0x11d   :  { %4574 = vmatpush3.msra.mxu0 %v1789_v18  ;;  %4608 = vmatprep.subr.mxu1 %v1837_v60  ;;  %v5013_v60 = vld [vmem:[#allocation5 + $0x18c] ss:$28 sps:$4 sm:$0xff]  }
 0x11e   :  { %v5635_v19 = vpop.f32.mrf.mxu0  ;;  %4609 = vmatpush3.msra.mxu1 %v1821_v61  ;;  %v5016_v61 = vld [vmem:[#allocation5 + $0x50c] ss:$28 sps:$4 sm:$0xff]  }
 0x11f   :  { %v5637_v20 = vpop.f32.mrf.mxu1  ;;  %v1492_v3 = vadd.f32 %v5635_v19, %v295_v1 }
 0x120   :  { %v5639_v21 = vpop.f32.mrf.mxu0 }
 0x121   :  { %v5641_v22 = vpop.f32.mrf.mxu1  ;;  %v1494_v35 = vadd.f32 %v5639_v21, %v299_v2  ;;  %v1533_v4 = vadd.f32 %v5637_v20, %v1492_v3  ;;  %v4297_v2 = vld [vmem:[%s5828_s4] ss:$0 sm:$0xff] }
 0x122   :  { %v1495_v23 = vpop.f32.mrf.mxu0 }
 0x123   :  { %v1536_v24 = vpop.f32.mrf.mxu1  ;;  %v1535_v8 = vadd.f32 %v5641_v22, %v1494_v35  ;;  %v5757_v22 = vsub.s32 2, %v5739_v47 }
 0x124   :  { %v1496_v25 = vpop.f32.mrf.mxu0 }
 0x125   :  { %v1537_v26 = vpop.f32.mrf.mxu1  ;;  %v303_v30 = vrot.slane %v290_v63, %v5757_v22 }
 0x13f   :  { %v1614_v49 = vpop.f32.mrf.mxu1 }
 0x141   :  { %v1616_v53 = vpop.f32.mrf.mxu1 }
 0x143   :  { %v1618_v56 = vpop.f32.mrf.mxu1 }
 0x145   :  { %v1619_v15 = vpop.f32.mrf.mxu1 }
 0x15e   :  { %v1573_v5 = vpop.f32.mrf.mxu0 }
 0x15f   :  { %v1574_v9 = vadd.f32 %v1573_v5, %v1533_v4 }
 0x160   :  { %v1575_v10 = vpop.f32.mrf.mxu0 }
 0x161   :  { %v1576_v11 = vadd.f32 %v1575_v10, %v1535_v8  ;;  %v1615_v12 = vadd.f32 %v1614_v49, %v1574_v9  ;;  %v5433_v49 = vmov 1983009808   ;;  %v5011_v8 = vld [vmem:[#allocation5 + $0x188] ss:$28 sps:$4 sm:$0xff]  }
 0x162   :  { %v1577_v13 = vpop.f32.mrf.mxu0  ;;  %v2026_v50 = vunpack.c.l.s4 %v5433_v49  ;;  %v5014_v9 = vld [vmem:[#allocation5 + $0x508] ss:$28 sps:$4 sm:$0xff]   ;;  %v5068_v49 = vld [vmem:[#allocation5 + $0x690] ss:$28 sps:$4 sm:$0xff]  }
 0x163   :  { %v1617_v14 = vadd.f32 %v1616_v53, %v1576_v11  ;;  %v1785_v23 = vmax.f32 %v1615_v12, 0.0  ;;  %v2000_v53 = vld [vmem:[%s5829_s5] sm:$0xff]  ;;  %v5019_v11 = vld [vmem:[#allocation5 + $0x154] ss:$28 sps:$4 sm:$0xff]  }
 0x164   :  { %v1578_v17 = vpop.f32.mrf.mxu0  ;;  %v2027_v52 = vunpack.c.0.s8 %v2026_v50  ;;  %v2024_v55 = vcombine.high %v2000_v53, %v2000_v53  ;;  %v5022_v12 = vld [vmem:[#allocation5 + $0x4d4] ss:$28 sps:$4 sm:$0xff]   ;;  %v5073_v50 = vld [vmem:[#allocation5 + $0x2dc] ss:$28 sps:$4 sm:$0xff]  }
 0x165   :  { %v1786_v18 = vmax.f32 %v1617_v14, 0.0  ;;  %v5017_v13 = vld [vmem:[#allocation5 + $0x150] ss:$28 sps:$4 sm:$0xff]   ;;  %v5025_v17 = vld [vmem:[#allocation5 + $0x11c] ss:$28 sps:$4 sm:$0xff]  }
 0x166   :  { %v2030_v54 = vsub.s32 %v2027_v52, %v5739_v47  ;;  %v5020_v14 = vld [vmem:[#allocation5 + $0x4d0] ss:$28 sps:$4 sm:$0xff]   ;;  %v5076_v52 = vld [vmem:[#allocation5 + $0x65c] ss:$28 sps:$4 sm:$0xff]  }
 0x167   :  { %1924 = vmatprep.mubr.f32.mxu0 %v1786_v18  ;;  %v5028_v18 = vld [vmem:[#allocation5 + $0x49c] ss:$28 sps:$4 sm:$0xff]  }
 0x168   :  { %1925 = vmatmul.mubr.f32.vlgmr.msra.gmra.mxu0 %v1785_v23  ;;  %v2031_v56 = vrot.slane %v2000_v53, %v2030_v54  ;;  %v2038_v57 = vrot.slane %v2024_v55, %v2030_v54  ;;  %v5023_v23 = vld [vmem:[#allocation5 + $0x118] ss:$28 sps:$4 sm:$0xff]   ;;  %v5079_v55 = vld [vmem:[#allocation5 + $0x2a4] ss:$28 sps:$4 sm:$0xff]  }
 0x169   :  { %2118 = vmatprep.mubr.f32.mxu0 %v5434_v59  ;;  %v5071_v53 = vld [vmem:[#allocation5 + $0x2d8] ss:$28 sps:$4 sm:$0xff]  }
 0x16a   :  { %v2039_v58 = vcombine.high %v2031_v56, %v2031_v56  ;;  %v2040_v15 = vcombine.high %v2038_v57, %v2038_v57  ;;  %v5074_v54 = vld [vmem:[#allocation5 + $0x658] ss:$28 sps:$4 sm:$0xff]  }
 0x16c   :  { %4298 = vmatprep.subr.msk.mxu0 %vm2045_vm0, %v2039_v58  ;;  %4301 = vmatprep.subr.msk.mxu1 %vm2045_vm0, %v2040_v15  ;;  %v5080_v58 = vld [vmem:[#allocation5 + $0x620] ss:$28 sps:$4 sm:$0xff]   ;;  %v5085_v15 = vld [vmem:[#allocation5 + $0x26c] ss:$28 sps:$4 sm:$0xff]  }
 0x16d   :  { %4299 = vmatpush1.msk.msra.mxu0 %vm2045_vm0, %v2031_v56  ;;  %v5082_v56 = vld [vmem:[#allocation5 + $0x624] ss:$28 sps:$4 sm:$0xff]  }
 0x16e   :  { %3649 = vmatprep.subr.bf16.mxu0 %v5013_v60  ;;  %v5083_v60 = vld [vmem:[#allocation5 + $0x268] ss:$28 sps:$4 sm:$0xff]  }
 0x17f   :  { %v1655_v24 = vpop.f32.mrf.mxu1 }
 0x180   :  { %v1656_v32 = vadd.f32 %v1655_v24, %v303_v30  ;;  %v5026_v24 = vld [vmem:[#allocation5 + $0x498] ss:$28 sps:$4 sm:$0xff]   ;;  %v5038_v30 = vld [vmem:[#allocation5 + $0x428] ss:$28 sps:$4 sm:$0xff]  }
 0x181   :  { %v1657_v19 = vpop.f32.mrf.mxu1 }
 0x182   :  { %v1658_v33 = vadd.f32 %v1657_v19, %v307_v31  ;;  %v5031_v19 = vld [vmem:[#allocation5 + $0xe4] ss:$28 sps:$4 sm:$0xff]   ;;  %v5043_v31 = vld [vmem:[#allocation5 + $0x74] ss:$28 sps:$4 sm:$0xff]  }
 0x183   :  { %v1659_v25 = vpop.f32.mrf.mxu1 }
 0x184   :  { %v5034_v25 = vld [vmem:[#allocation5 + $0x464] ss:$28 sps:$4 sm:$0xff]  }
 0x185   :  { %v1660_v21 = vpop.f32.mrf.mxu1 }
 0x186   :  { %v5029_v21 = vld [vmem:[#allocation5 + $0xe0] ss:$28 sps:$4 sm:$0xff]  }
 0x19e   :  { %v1696_v26 = vpop.f32.mrf.mxu0 }
 0x19f   :  { %v1697_v7 = vadd.f32 %v1696_v26, %v1656_v32  ;;  %v5032_v26 = vld [vmem:[#allocation5 + $0x460] ss:$28 sps:$4 sm:$0xff]   ;;  %v5046_v32 = vld [vmem:[#allocation5 + $0x3f4] ss:$28 sps:$4 sm:$0xff]  }
 0x1a0   :  { %v1698_v20 = vpop.f32.mrf.mxu0 }
 0x1a1   :  { %v1699_v36 = vadd.f32 %v1698_v20, %v1658_v33  ;;  %v5037_v20 = vld [vmem:[#allocation5 + $0xac] ss:$28 sps:$4 sm:$0xff]  }
 0x1a2   :  { %v1700_v27 = vpop.f32.mrf.mxu0  ;;  %v5041_v33 = vld [vmem:[#allocation5 + $0x70] ss:$28 sps:$4 sm:$0xff]  }
 0x1a3   :  { %v5040_v27 = vld [vmem:[#allocation5 + $0x42c] ss:$28 sps:$4 sm:$0xff]  }
 0x1a4   :  { %v1701_v28 = vpop.f32.mrf.mxu0 }
 0x1a5   :  { %v5035_v28 = vld [vmem:[#allocation5 + $0xa8] ss:$28 sps:$4 sm:$0xff]  }
 0x1be   :  { %v1778_v34 = vpop.f32.mrf.mxu0 }
 0x1bf   :  { %v1737_v51 = vpop.f32.mrf.mxu1 }
 0x1c0   :  { %v1738_v37 = vadd.f32 %v1737_v51, %v1697_v7  ;;  %v1780_v16 = vpop.f32.mrf.mxu0  ;;  %v5044_v7 = vld [vmem:[#allocation5 + $0x3f0] ss:$28 sps:$4 sm:$0xff]   ;;  %v5049_v51 = vld [vmem:[#allocation5 + $0x3c] ss:$28 sps:$4 sm:$0xff]  }
 0x1c1   :  { %v1739_v38 = vpop.f32.mrf.mxu1 }
 0x1c2   :  { %v1740_v39 = vadd.f32 %v1739_v38, %v1699_v36  ;;  %v1779_v40 = vadd.f32 %v1778_v34, %v1738_v37  ;;  %v1782_v42 = vpop.f32.mrf.mxu0  ;;  %v5052_v34 = vld [vmem:[#allocation5 + $0x3bc] ss:$28 sps:$4 sm:$0xff]   ;;  %v5055_v38 = vld [vmem:[#allocation5 + $0x4] ss:$28 sps:$4 sm:$0xff]  }
 0x1c3   :  { %v1741_v41 = vpop.f32.mrf.mxu1  ;;  %v5047_v36 = vld [vmem:[#allocation5 + $0x38] ss:$28 sps:$4 sm:$0xff]   ;;  %v5064_v42 = vld [vmem:[#allocation5 + $0x6cc] ss:$28 sps:$4 sm:$0xff]  }
 0x1c4   :  { %v1781_v43 = vadd.f32 %v1780_v16, %v1740_v39  ;;  %v1783_v45 = vpop.f32.mrf.mxu0  ;;  %v1787_v48 = vmax.f32 %v1779_v40, 0.0  ;;  %v5050_v37 = vld [vmem:[#allocation5 + $0x3b8] ss:$28 sps:$4 sm:$0xff]   ;;  %v5058_v16 = vld [vmem:[#allocation5 + $0x384] ss:$28 sps:$4 sm:$0xff]  }
 0x1c5   :  { %v1742_v44 = vpop.f32.mrf.mxu1  ;;  %v5053_v39 = vld [vmem:[#allocation5] ss:$28 sps:$4 sm:$0xff]   ;;  %v5061_v41 = vld [vmem:[#allocation5 + $0x34c] ss:$28 sps:$4 sm:$0xff]   ;;  %v5067_v45 = vld [vmem:[#allocation5 + $0x314] ss:$28 sps:$4 sm:$0xff]  }
 0x1c6   :  { %v1788_v46 = vmax.f32 %v1781_v43, 0.0  ;;  %v5056_v40 = vld [vmem:[#allocation5 + $0x380] ss:$28 sps:$4 sm:$0xff]   ;;  %v5059_v43 = vld [vmem:[#allocation5 + $0x348] ss:$28 sps:$4 sm:$0xff]  }
 0x1c7   :  { %v5062_v44 = vld [vmem:[#allocation5 + $0x6c8] ss:$28 sps:$4 sm:$0xff]  }
 0x1c8   :  { %1994 = vmatprep.mubr.f32.mxu1 %v1788_v46  ;;  %v5070_v46 = vld [vmem:[#allocation5 + $0x694] ss:$28 sps:$4 sm:$0xff]  }
 0x1c9   :  { %1995 = vmatmul.mubr.f32.vlgmr.msra.gmra.mxu1 %v1787_v48  ;;  %v5065_v48 = vld [vmem:[#allocation5 + $0x310] ss:$28 sps:$4 sm:$0xff]  }
 0x1ca   :  { %4302 = vmatpush1.msk.msra.mxu1 %vm2045_vm0, %v2038_v57  ;;  %2189 = vmatprep.mubr.f32.mxu1 %v5434_v59  ;;  %v5077_v57 = vld [vmem:[#allocation5 + $0x2a0] ss:$28 sps:$4 sm:$0xff]   ;;  %v5088_v59 = vld [vmem:[#allocation5 + $0x5ec] ss:$28 sps:$4 sm:$0xff]  }
 0x1cb   :  { %3690 = vmatprep.subr.bf16.mxu1 %v5016_v61  ;;  %v5086_v61 = vld [vmem:[#allocation5 + $0x5e8] ss:$28 sps:$4 sm:$0xff]  }
 0x228   :  { %v4575_v62 = vpop.f32.mrf.mxu0 }
 0x22a   :  { %v4576_v63 = vpop.f32.mrf.mxu0 }
 0x22b   :  { %v4577_v1 = vadd.f32 %v4576_v63, %v4575_v62  ;;  %v5091_v62 = vld [vmem:[#allocation5 + $0x234] ss:$28 sps:$4 sm:$0xff]  }
 0x22c   :  { %v5094_v63 = vld [vmem:[#allocation5 + $0x5b4] ss:$28 sps:$4 sm:$0xff]  }
 0x22d   :  { %v1927_v4 = vadd.f32 %v4577_v1, %v4297_v2  ;;  %v5089_v1 = vld [vmem:[#allocation5 + $0x230] ss:$28 sps:$4 sm:$0xff]  }
 0x22e   :  { %v5092_v2 = vld [vmem:[#allocation5 + $0x5b0] ss:$28 sps:$4 sm:$0xff]  }
 0x289   :  { %v4610_v3 = vpop.f32.mrf.mxu1 }
 0x28b   :  { %v4611_v35 = vpop.f32.mrf.mxu1 }
 0x28c   :  { %v4612_v5 = vadd.f32 %v4611_v35, %v4610_v3  ;;  %v5097_v3 = vld [vmem:[#allocation5 + $0x1fc] ss:$28 sps:$4 sm:$0xff]  }
 0x28d   :  { %v5100_v35 = vld [vmem:[#allocation5 + $0x57c] ss:$28 sps:$4 sm:$0xff]  }
 0x28e   :  { %v1997_v10 = vadd.f32 %v4612_v5, %v1927_v4  ;;  %v5095_v4 = vld [vmem:[#allocation5 + $0x1f8] ss:$28 sps:$4 sm:$0xff]  }
 0x28f   :  { %v5098_v5 = vld [vmem:[#allocation5 + $0x578] ss:$28 sps:$4 sm:$0xff]  }
 0x290   :  { %4300 = vmatmul.mubr.msk.f32.vlgmr.msra.gmra.mxu0 %vm2041_vm1, %v1997_v10  ;;  %4303 = vmatmul.mubr.msk.f32.vlgmr.msra.gmra.mxu1 %vm2041_vm1, %v1997_v10  ;;  %v5101_v10 = vld [vmem:[#allocation5 + $0x1c0] ss:$28 sps:$4 sm:$0xff]  }
 0x291   :  { %3650 = vmatpush1.bf16.msra.mxu0 %v5011_v8  ;;  %3691 = vmatpush1.bf16.msra.mxu1 %v5014_v9  ;;  %v5103_v8 = vld [vmem:[#allocation5 + $0x1c4] ss:$28 sps:$4 sm:$0xff]  }
 0x292   :  { %3651 = vmatprep.subr.bf16.mxu0 %v5019_v11  ;;  %3692 = vmatprep.subr.bf16.mxu1 %v5022_v12  ;;  %v5106_v9 = vld [vmem:[#allocation5 + $0x544] ss:$28 sps:$4 sm:$0xff]   ;;  %v5109_v12 = vld [vmem:[#allocation5 + $0x194] ss:$28 sps:$4 sm:$0xff]  }
 0x293   :  { %v5104_v11 = vld [vmem:[#allocation5 + $0x540] ss:$28 sps:$4 sm:$0xff]  }
 0x295   :  { %3652 = vmatpush1.bf16.msra.mxu0 %v5017_v13  ;;  %3693 = vmatpush1.bf16.msra.mxu1 %v5020_v14  ;;  %v5112_v13 = vld [vmem:[#allocation5 + $0x514] ss:$28 sps:$4 sm:$0xff]   ;;  %v2001_v14 = vld [vmem:[%s5830_s6] sm:$0xf] }
 0x296   :  { %3653 = vmatprep.subr.bf16.mxu0 %v5025_v17  ;;  %3694 = vmatprep.subr.bf16.mxu1 %v5028_v18  ;;  %v2006_v17 = vrot.slane %v2001_v14, %v5742_v6  ;;  %v2014_v18 = vrot.slane %v2001_v14, %v5757_v22 }
 0x299   :  { %3654 = vmatpush1.bf16.msra.mxu0 %v5023_v23  ;;  %3695 = vmatpush1.bf16.msra.mxu1 %v5026_v24  ;;  %v2010_v23 = vrot.slane %v2001_v14, %v5748_v0  ;;  %v2018_v24 = vrot.slane %v2001_v14, %v5760_v29  ;;  %v5169_v14 = vld [vmem:[#allocation5 + $0x2e4] ss:$28 sps:$4 sm:$0xff]  }
 0x29a   :  { %3655 = vmatprep.subr.bf16.mxu0 %v5031_v19  ;;  %3696 = vmatprep.subr.bf16.mxu1 %v5034_v25 }
 0x29d   :  { %3656 = vmatpush1.bf16.msra.mxu0 %v5029_v21  ;;  %3697 = vmatpush1.bf16.msra.mxu1 %v5032_v26 }
 0x29e   :  { %3657 = vmatprep.subr.bf16.mxu0 %v5037_v20  ;;  %3698 = vmatprep.subr.bf16.mxu1 %v5040_v27 }
 0x2a1   :  { %3658 = vmatpush1.bf16.msra.mxu0 %v5035_v28  ;;  %3699 = vmatpush1.bf16.msra.mxu1 %v5038_v30 }
 0x2a2   :  { %3659 = vmatprep.subr.bf16.mxu0 %v5043_v31  ;;  %3700 = vmatprep.subr.bf16.mxu1 %v5046_v32 }
 0x2a5   :  { %3660 = vmatpush1.bf16.msra.mxu0 %v5041_v33  ;;  %3701 = vmatpush1.bf16.msra.mxu1 %v5044_v7 }
 0x2a6   :  { %3661 = vmatprep.subr.bf16.mxu0 %v5049_v51  ;;  %3702 = vmatprep.subr.bf16.mxu1 %v5052_v34 }
 0x2a9   :  { %3662 = vmatpush1.bf16.msra.mxu0 %v5047_v36  ;;  %3703 = vmatpush1.bf16.msra.mxu1 %v5050_v37  ;;  %v5107_v36 = vld [vmem:[#allocation5 + $0x190] ss:$28 sps:$4 sm:$0xff]  }
 0x2aa   :  { %3663 = vmatprep.subr.bf16.mxu0 %v5055_v38  ;;  %3704 = vmatprep.subr.bf16.mxu1 %v5058_v16  ;;  %v5110_v37 = vld [vmem:[#allocation5 + $0x510] ss:$28 sps:$4 sm:$0xff]  }
 0x2ad   :  { %3664 = vmatpush1.bf16.msra.mxu0 %v5053_v39  ;;  %3705 = vmatpush1.bf16.msra.mxu1 %v5056_v40  ;;  %v5115_v39 = vld [vmem:[#allocation5 + $0x15c] ss:$28 sps:$4 sm:$0xff]  }
 0x2ae   :  { %3665 = vmatprep.subr.bf16.mxu0 %v5061_v41  ;;  %3706 = vmatprep.subr.bf16.mxu1 %v5064_v42  ;;  %v5118_v40 = vld [vmem:[#allocation5 + $0x4dc] ss:$28 sps:$4 sm:$0xff]  }
 0x2af   :  { %v5113_v41 = vld [vmem:[#allocation5 + $0x158] ss:$28 sps:$4 sm:$0xff]  }
 0x2b0   :  { %v5116_v42 = vld [vmem:[#allocation5 + $0x4d8] ss:$28 sps:$4 sm:$0xff]  }
 0x2b1   :  { %3666 = vmatpush2.bf16.msra.mxu0 %v5059_v43  ;;  %3707 = vmatpush2.bf16.msra.mxu1 %v5062_v44  ;;  %v5121_v43 = vld [vmem:[#allocation5 + $0x124] ss:$28 sps:$4 sm:$0xff]  }
 0x2b2   :  { %3667 = vmatprep.subr.bf16.mxu0 %v5067_v45  ;;  %3708 = vmatprep.subr.bf16.mxu1 %v5070_v46  ;;  %v5124_v44 = vld [vmem:[#allocation5 + $0x4a4] ss:$28 sps:$4 sm:$0xff]  }
 0x2b3   :  { %v5119_v45 = vld [vmem:[#allocation5 + $0x120] ss:$28 sps:$4 sm:$0xff]  }
 0x2b4   :  { %v5122_v46 = vld [vmem:[#allocation5 + $0x4a0] ss:$28 sps:$4 sm:$0xff]  }
 0x2b5   :  { %3668 = vmatpush2.bf16.msra.mxu0 %v5065_v48  ;;  %3709 = vmatpush2.bf16.msra.mxu1 %v5068_v49  ;;  %v5127_v48 = vld [vmem:[#allocation5 + $0xec] ss:$28 sps:$4 sm:$0xff]  }
 0x2b6   :  { %3669 = vmatprep.subr.bf16.mxu0 %v5073_v50  ;;  %3710 = vmatprep.subr.bf16.mxu1 %v5076_v52  ;;  %v5130_v49 = vld [vmem:[#allocation5 + $0x46c] ss:$28 sps:$4 sm:$0xff]  }
 0x2b7   :  { %v5125_v50 = vld [vmem:[#allocation5 + $0xe8] ss:$28 sps:$4 sm:$0xff]  }
 0x2b8   :  { %v5128_v52 = vld [vmem:[#allocation5 + $0x468] ss:$28 sps:$4 sm:$0xff]  }
 0x2b9   :  { %3670 = vmatpush2.bf16.msra.mxu0 %v5071_v53  ;;  %3711 = vmatpush2.bf16.msra.mxu1 %v5074_v54  ;;  %v5133_v53 = vld [vmem:[#allocation5 + $0xb4] ss:$28 sps:$4 sm:$0xff]  }
 0x2ba   :  { %3671 = vmatprep.subr.bf16.mxu0 %v5079_v55  ;;  %3712 = vmatprep.subr.bf16.mxu1 %v5082_v56  ;;  %v5136_v54 = vld [vmem:[#allocation5 + $0x434] ss:$28 sps:$4 sm:$0xff]  }
 0x2bb   :  { %v5131_v55 = vld [vmem:[#allocation5 + $0xb0] ss:$28 sps:$4 sm:$0xff]  }
 0x2bc   :  { %v5134_v56 = vld [vmem:[#allocation5 + $0x430] ss:$28 sps:$4 sm:$0xff]  }
 0x2bd   :  { %3672 = vmatpush2.bf16.msra.mxu0 %v5077_v57  ;;  %3713 = vmatpush2.bf16.msra.mxu1 %v5080_v58  ;;  %v5139_v57 = vld [vmem:[#allocation5 + $0x7c] ss:$28 sps:$4 sm:$0xff]  }
 0x2be   :  { %3673 = vmatprep.subr.bf16.mxu0 %v5085_v15  ;;  %3714 = vmatprep.subr.bf16.mxu1 %v5088_v59  ;;  %v5142_v58 = vld [vmem:[#allocation5 + $0x3fc] ss:$28 sps:$4 sm:$0xff]  }
 0x2bf   :  { %v5137_v15 = vld [vmem:[#allocation5 + $0x78] ss:$28 sps:$4 sm:$0xff]  }
 0x2c0   :  { %v5140_v59 = vld [vmem:[#allocation5 + $0x3f8] ss:$28 sps:$4 sm:$0xff]  }
 0x2c1   :  { %3674 = vmatpush2.bf16.msra.mxu0 %v5083_v60  ;;  %3715 = vmatpush2.bf16.msra.mxu1 %v5086_v61  ;;  %v5145_v60 = vld [vmem:[#allocation5 + $0x44] ss:$28 sps:$4 sm:$0xff]  }
 0x2c2   :  { %3675 = vmatprep.subr.bf16.mxu0 %v5091_v62  ;;  %3716 = vmatprep.subr.bf16.mxu1 %v5094_v63  ;;  %v5148_v61 = vld [vmem:[#allocation5 + $0x3c4] ss:$28 sps:$4 sm:$0xff]  }
 0x2c3   :  { %v5143_v62 = vld [vmem:[#allocation5 + $0x40] ss:$28 sps:$4 sm:$0xff]  }
 0x2c4   :  { %v5146_v63 = vld [vmem:[#allocation5 + $0x3c0] ss:$28 sps:$4 sm:$0xff]  }
 0x2c5   :  { %3676 = vmatpush2.bf16.msra.mxu0 %v5089_v1  ;;  %3717 = vmatpush2.bf16.msra.mxu1 %v5092_v2  ;;  %v5151_v1 = vld [vmem:[#allocation5 + $0xc] ss:$28 sps:$4 sm:$0xff]  }
 0x2c6   :  { %3677 = vmatprep.subr.bf16.mxu0 %v5097_v3  ;;  %3718 = vmatprep.subr.bf16.mxu1 %v5100_v35  ;;  %v5154_v2 = vld [vmem:[#allocation5 + $0x38c] ss:$28 sps:$4 sm:$0xff]  }
 0x2c7   :  { %v5149_v3 = vld [vmem:[#allocation5 + $0x8] ss:$28 sps:$4 sm:$0xff]  }
 0x2c8   :  { %v5152_v35 = vld [vmem:[#allocation5 + $0x388] ss:$28 sps:$4 sm:$0xff]  }
 0x2c9   :  { %3678 = vmatpush2.bf16.msra.mxu0 %v5095_v4  ;;  %3719 = vmatpush2.bf16.msra.mxu1 %v5098_v5  ;;  %v5157_v4 = vld [vmem:[#allocation5 + $0x354] ss:$28 sps:$4 sm:$0xff]  }
 0x2ca   :  { %3679 = vmatprep.subr.bf16.mxu0 %v5103_v8  ;;  %3720 = vmatprep.subr.bf16.mxu1 %v5106_v9  ;;  %v5160_v5 = vld [vmem:[#allocation5 + $0x6d4] ss:$28 sps:$4 sm:$0xff]  }
 0x2cb   :  { %v5155_v8 = vld [vmem:[#allocation5 + $0x350] ss:$28 sps:$4 sm:$0xff]  }
 0x2cc   :  { %v5158_v9 = vld [vmem:[#allocation5 + $0x6d0] ss:$28 sps:$4 sm:$0xff]  }
 0x2cd   :  { %3680 = vmatpush2.bf16.msra.mxu0 %v5101_v10  ;;  %3721 = vmatpush2.bf16.msra.mxu1 %v5104_v11  ;;  %v5163_v10 = vld [vmem:[#allocation5 + $0x31c] ss:$28 sps:$4 sm:$0xff]  }
 0x2ce   :  { %3731 = vmatprep.subr.bf16.mxu0 %v5109_v12  ;;  %3772 = vmatprep.subr.bf16.mxu1 %v5112_v13  ;;  %v5166_v11 = vld [vmem:[#allocation5 + $0x69c] ss:$28 sps:$4 sm:$0xff]  }
 0x2cf   :  { %v5161_v12 = vld [vmem:[#allocation5 + $0x318] ss:$28 sps:$4 sm:$0xff]  }
 0x2d0   :  { %v5164_v13 = vld [vmem:[#allocation5 + $0x698] ss:$28 sps:$4 sm:$0xff]  }
 0x350   :  { %v2120_v19 = vpop.f32.mrf.mxu0  ;;  %v2191_v25 = vpop.f32.mrf.mxu1 }
 0x351   :  { %v2121_v21 = vadd.f32 %v2120_v19, %v2006_v17  ;;  %v2192_v26 = vadd.f32 %v2191_v25, %v2014_v18  ;;  %v5172_v17 = vld [vmem:[#allocation5 + $0x664] ss:$28 sps:$4 sm:$0xff]   ;;  %v5178_v19 = vld [vmem:[#allocation5 + $0x62c] ss:$28 sps:$4 sm:$0xff]  }
 0x352   :  { %v2122_v20 = vpop.f32.mrf.mxu0  ;;  %v2193_v27 = vpop.f32.mrf.mxu1  ;;  %v5167_v18 = vld [vmem:[#allocation5 + $0x2e0] ss:$28 sps:$4 sm:$0xff]   ;;  %v5173_v25 = vld [vmem:[#allocation5 + $0x2a8] ss:$28 sps:$4 sm:$0xff]  }
 0x353   :  { %v2123_v28 = vadd.f32 %v2122_v20, %v2010_v23  ;;  %v2194_v30 = vadd.f32 %v2193_v27, %v2018_v24  ;;  %v2196_v31 = vmax.f32 %v2121_v21, 0.0  ;;  %v2198_v32 = vmax.f32 %v2192_v26, 0.0  ;;  %v5170_v23 = vld [vmem:[#allocation5 + $0x660] ss:$28 sps:$4 sm:$0xff]   ;;  %v5175_v24 = vld [vmem:[#allocation5 + $0x2ac] ss:$28 sps:$4 sm:$0xff]  }
 0x354   :  { %v5176_v21 = vld [vmem:[#allocation5 + $0x628] ss:$28 sps:$4 sm:$0xff]   ;;  %v5181_v26 = vld [vmem:[#allocation5 + $0x274] ss:$28 sps:$4 sm:$0xff]  }
 0x355   :  { %v2197_v33 = vmax.f32 %v2123_v28, 0.0  ;;  %v2199_v7 = vmax.f32 %v2194_v30, 0.0  ;;  %v5782_v38 = vpack.c.bf16 %v2196_v31, %v2196_v31  ;;  %v5784_v16 = vpack.c.bf16 %v2198_v32, %v2198_v32  ;;  %v5184_v20 = vld [vmem:[#allocation5 + $0x5f4] ss:$28 sps:$4 sm:$0xff]   ;;  %v5187_v30 = vld [vmem:[#allocation5 + $0x23c] ss:$28 sps:$4 sm:$0xff]  }
 0x356   :  { %v5179_v27 = vld [vmem:[#allocation5 + $0x270] ss:$28 sps:$4 sm:$0xff]   ;;  %v5190_v31 = vld [vmem:[#allocation5 + $0x5bc] ss:$28 sps:$4 sm:$0xff]  }
 0x357   :  { %v5778_v51 = vpack.c.bf16 %v2197_v33, %v2197_v33  ;;  %v5780_v34 = vpack.c.bf16 %v2199_v7, %v2199_v7  ;;  %v5182_v28 = vld [vmem:[#allocation5 + $0x5f0] ss:$28 sps:$4 sm:$0xff]   ;;  %v5185_v32 = vld [vmem:[#allocation5 + $0x238] ss:$28 sps:$4 sm:$0xff]   ;;  %v5193_v7 = vld [vmem:[#allocation5 + $0x204] ss:$28 sps:$4 sm:$0xff]  }
 0x358   :  { %v5188_v33 = vld [vmem:[#allocation5 + $0x5b8] ss:$28 sps:$4 sm:$0xff]  }
 0x359   :  { %3681 = vmatprep.mubr.bf16.mxu0 %v5778_v51  ;;  %3722 = vmatprep.mubr.bf16.mxu1 %v5780_v34 }
 0x35a   :  { %3682 = vmatmul.mubr.bf16.vlgmr.msra.gmra.mxu0 %v5782_v38  ;;  %3723 = vmatmul.mubr.bf16.vlgmr.msra.gmra.mxu1 %v5784_v16 }
 0x35b   :  { %3732 = vmatpush1.bf16.msra.mxu0 %v5107_v36  ;;  %3773 = vmatpush1.bf16.msra.mxu1 %v5110_v37  ;;  %v5196_v36 = vld [vmem:[#allocation5 + $0x584] ss:$28 sps:$4 sm:$0xff]  }
 0x35c   :  { %3763 = vmatprep.mubr.bf16.mxu0 %v5778_v51  ;;  %3804 = vmatprep.mubr.bf16.mxu1 %v5780_v34  ;;  %v5191_v37 = vld [vmem:[#allocation5 + $0x200] ss:$28 sps:$4 sm:$0xff]  }
 0x35d   :  { %3733 = vmatprep.subr.bf16.mxu0 %v5115_v39  ;;  %3774 = vmatprep.subr.bf16.mxu1 %v5118_v40  ;;  %v5194_v39 = vld [vmem:[#allocation5 + $0x580] ss:$28 sps:$4 sm:$0xff]   ;;  %v5199_v40 = vld [vmem:[#allocation5 + $0x1cc] ss:$28 sps:$4 sm:$0xff]  }
 0x35f   :  { %3734 = vmatpush1.bf16.msra.mxu0 %v5113_v41  ;;  %3775 = vmatpush1.bf16.msra.mxu1 %v5116_v42  ;;  %v5202_v41 = vld [vmem:[#allocation5 + $0x54c] ss:$28 sps:$4 sm:$0xff]  }
 0x360   :  { %3735 = vmatprep.subr.bf16.mxu0 %v5121_v43  ;;  %3776 = vmatprep.subr.bf16.mxu1 %v5124_v44  ;;  %v5197_v42 = vld [vmem:[#allocation5 + $0x1c8] ss:$28 sps:$4 sm:$0xff]   ;;  %v5205_v44 = vld [vmem:[#allocation5 + $0x19c] ss:$28 sps:$4 sm:$0xff]  }
 0x361   :  { %v5200_v43 = vld [vmem:[#allocation5 + $0x548] ss:$28 sps:$4 sm:$0xff]  }
 0x363   :  { %3736 = vmatpush1.bf16.msra.mxu0 %v5119_v45  ;;  %3777 = vmatpush1.bf16.msra.mxu1 %v5122_v46  ;;  %v5208_v45 = vld [vmem:[#allocation5 + $0x51c] ss:$28 sps:$4 sm:$0xff]  }
 0x364   :  { %3737 = vmatprep.subr.bf16.mxu0 %v5127_v48  ;;  %3778 = vmatprep.subr.bf16.mxu1 %v5130_v49  ;;  %v5203_v46 = vld [vmem:[#allocation5 + $0x198] ss:$28 sps:$4 sm:$0xff]   ;;  %v5211_v49 = vld [vmem:[#allocation5 + $0x164] ss:$28 sps:$4 sm:$0xff]  }
 0x365   :  { %v5206_v48 = vld [vmem:[#allocation5 + $0x518] ss:$28 sps:$4 sm:$0xff]  }
 0x367   :  { %3738 = vmatpush1.bf16.msra.mxu0 %v5125_v50  ;;  %3779 = vmatpush1.bf16.msra.mxu1 %v5128_v52  ;;  %v5214_v50 = vld [vmem:[#allocation5 + $0x4e4] ss:$28 sps:$4 sm:$0xff]  }
 0x368   :  { %3739 = vmatprep.subr.bf16.mxu0 %v5133_v53  ;;  %3780 = vmatprep.subr.bf16.mxu1 %v5136_v54  ;;  %v5209_v52 = vld [vmem:[#allocation5 + $0x160] ss:$28 sps:$4 sm:$0xff]   ;;  %v5217_v54 = vld [vmem:[#allocation5 + $0x12c] ss:$28 sps:$4 sm:$0xff]  }
 0x369   :  { %v5212_v53 = vld [vmem:[#allocation5 + $0x4e0] ss:$28 sps:$4 sm:$0xff]  }
 0x36b   :  { %3740 = vmatpush1.bf16.msra.mxu0 %v5131_v55  ;;  %3781 = vmatpush1.bf16.msra.mxu1 %v5134_v56  ;;  %v5220_v55 = vld [vmem:[#allocation5 + $0x4ac] ss:$28 sps:$4 sm:$0xff]  }
 0x36c   :  { %3741 = vmatprep.subr.bf16.mxu0 %v5139_v57  ;;  %3782 = vmatprep.subr.bf16.mxu1 %v5142_v58  ;;  %v5215_v56 = vld [vmem:[#allocation5 + $0x128] ss:$28 sps:$4 sm:$0xff]   ;;  %v5223_v58 = vld [vmem:[#allocation5 + $0xf4] ss:$28 sps:$4 sm:$0xff]  }
 0x36d   :  { %v5218_v57 = vld [vmem:[#allocation5 + $0x4a8] ss:$28 sps:$4 sm:$0xff]  }
 0x36f   :  { %3742 = vmatpush1.bf16.msra.mxu0 %v5137_v15  ;;  %3783 = vmatpush1.bf16.msra.mxu1 %v5140_v59  ;;  %v5226_v15 = vld [vmem:[#allocation5 + $0x474] ss:$28 sps:$4 sm:$0xff]  }
 0x370   :  { %3743 = vmatprep.subr.bf16.mxu0 %v5145_v60  ;;  %3784 = vmatprep.subr.bf16.mxu1 %v5148_v61  ;;  %v5221_v59 = vld [vmem:[#allocation5 + $0xf0] ss:$28 sps:$4 sm:$0xff]   ;;  %v5229_v61 = vld [vmem:[#allocation5 + $0xbc] ss:$28 sps:$4 sm:$0xff]  }
 0x371   :  { %v5224_v60 = vld [vmem:[#allocation5 + $0x470] ss:$28 sps:$4 sm:$0xff]  }
 0x373   :  { %3744 = vmatpush1.bf16.msra.mxu0 %v5143_v62  ;;  %3785 = vmatpush1.bf16.msra.mxu1 %v5146_v63  ;;  %v5232_v62 = vld [vmem:[#allocation5 + $0x43c] ss:$28 sps:$4 sm:$0xff]  }
 0x374   :  { %3745 = vmatprep.subr.bf16.mxu0 %v5151_v1  ;;  %3786 = vmatprep.subr.bf16.mxu1 %v5154_v2  ;;  %v5227_v63 = vld [vmem:[#allocation5 + $0xb8] ss:$28 sps:$4 sm:$0xff]   ;;  %v5235_v2 = vld [vmem:[#allocation5 + $0x84] ss:$28 sps:$4 sm:$0xff]  }
 0x375   :  { %v5230_v1 = vld [vmem:[#allocation5 + $0x438] ss:$28 sps:$4 sm:$0xff]  }
 0x377   :  { %3746 = vmatpush1.bf16.msra.mxu0 %v5149_v3  ;;  %3787 = vmatpush1.bf16.msra.mxu1 %v5152_v35  ;;  %v5238_v3 = vld [vmem:[#allocation5 + $0x404] ss:$28 sps:$4 sm:$0xff]  }
 0x378   :  { %3747 = vmatprep.subr.bf16.mxu0 %v5157_v4  ;;  %3788 = vmatprep.subr.bf16.mxu1 %v5160_v5  ;;  %v5233_v35 = vld [vmem:[#allocation5 + $0x80] ss:$28 sps:$4 sm:$0xff]   ;;  %v5241_v5 = vld [vmem:[#allocation5 + $0x4c] ss:$28 sps:$4 sm:$0xff]  }
 0x379   :  { %v5236_v4 = vld [vmem:[#allocation5 + $0x400] ss:$28 sps:$4 sm:$0xff]  }
 0x37b   :  { %3748 = vmatpush2.bf16.msra.mxu0 %v5155_v8  ;;  %3789 = vmatpush2.bf16.msra.mxu1 %v5158_v9  ;;  %v5244_v8 = vld [vmem:[#allocation5 + $0x3cc] ss:$28 sps:$4 sm:$0xff]  }
 0x37c   :  { %3749 = vmatprep.subr.bf16.mxu0 %v5163_v10  ;;  %3790 = vmatprep.subr.bf16.mxu1 %v5166_v11  ;;  %v5239_v9 = vld [vmem:[#allocation5 + $0x48] ss:$28 sps:$4 sm:$0xff]   ;;  %v5247_v11 = vld [vmem:[#allocation5 + $0x14] ss:$28 sps:$4 sm:$0xff]  }
 0x37d   :  { %v5242_v10 = vld [vmem:[#allocation5 + $0x3c8] ss:$28 sps:$4 sm:$0xff]  }
 0x37f   :  { %3750 = vmatpush2.bf16.msra.mxu0 %v5161_v12  ;;  %3791 = vmatpush2.bf16.msra.mxu1 %v5164_v13  ;;  %v5250_v12 = vld [vmem:[#allocation5 + $0x394] ss:$28 sps:$4 sm:$0xff]  }
 0x380   :  { %3751 = vmatprep.subr.bf16.mxu0 %v5169_v14  ;;  %3792 = vmatprep.subr.bf16.mxu1 %v5172_v17  ;;  %v5245_v13 = vld [vmem:[#allocation5 + $0x10] ss:$28 sps:$4 sm:$0xff]   ;;  %v5253_v17 = vld [vmem:[#allocation5 + $0x35c] ss:$28 sps:$4 sm:$0xff]  }
 0x381   :  { %v5248_v14 = vld [vmem:[#allocation5 + $0x390] ss:$28 sps:$4 sm:$0xff]  }
 0x383   :  { %3752 = vmatpush2.bf16.msra.mxu0 %v5167_v18  ;;  %3793 = vmatpush2.bf16.msra.mxu1 %v5170_v23  ;;  %v5256_v18 = vld [vmem:[#allocation5 + $0x6dc] ss:$28 sps:$4 sm:$0xff]  }
 0x384   :  { %3753 = vmatprep.subr.bf16.mxu0 %v5175_v24  ;;  %3794 = vmatprep.subr.bf16.mxu1 %v5178_v19  ;;  %v5251_v23 = vld [vmem:[#allocation5 + $0x358] ss:$28 sps:$4 sm:$0xff]   ;;  %v5259_v19 = vld [vmem:[#allocation5 + $0x324] ss:$28 sps:$4 sm:$0xff]  }
 0x385   :  { %v5254_v24 = vld [vmem:[#allocation5 + $0x6d8] ss:$28 sps:$4 sm:$0xff]  }
 0x387   :  { %3754 = vmatpush2.bf16.msra.mxu0 %v5173_v25  ;;  %3795 = vmatpush2.bf16.msra.mxu1 %v5176_v21  ;;  %v5262_v25 = vld [vmem:[#allocation5 + $0x6a4] ss:$28 sps:$4 sm:$0xff]  }
 0x388   :  { %3755 = vmatprep.subr.bf16.mxu0 %v5181_v26  ;;  %3796 = vmatprep.subr.bf16.mxu1 %v5184_v20  ;;  %v5257_v21 = vld [vmem:[#allocation5 + $0x320] ss:$28 sps:$4 sm:$0xff]   ;;  %v5265_v20 = vld [vmem:[#allocation5 + $0x2ec] ss:$28 sps:$4 sm:$0xff]  }
 0x389   :  { %v5260_v26 = vld [vmem:[#allocation5 + $0x6a0] ss:$28 sps:$4 sm:$0xff]  }
 0x38b   :  { %3756 = vmatpush2.bf16.msra.mxu0 %v5179_v27  ;;  %3797 = vmatpush2.bf16.msra.mxu1 %v5182_v28  ;;  %v5268_v27 = vld [vmem:[#allocation5 + $0x66c] ss:$28 sps:$4 sm:$0xff]  }
 0x38c   :  { %3757 = vmatprep.subr.bf16.mxu0 %v5187_v30  ;;  %3798 = vmatprep.subr.bf16.mxu1 %v5190_v31  ;;  %v5263_v28 = vld [vmem:[#allocation5 + $0x2e8] ss:$28 sps:$4 sm:$0xff]   ;;  %v5271_v31 = vld [vmem:[#allocation5 + $0x2b4] ss:$28 sps:$4 sm:$0xff]  }
 0x38d   :  { %v5266_v30 = vld [vmem:[#allocation5 + $0x668] ss:$28 sps:$4 sm:$0xff]  }
 0x38f   :  { %3758 = vmatpush2.bf16.msra.mxu0 %v5185_v32  ;;  %3799 = vmatpush2.bf16.msra.mxu1 %v5188_v33  ;;  %v5274_v32 = vld [vmem:[#allocation5 + $0x634] ss:$28 sps:$4 sm:$0xff]  }
 0x390   :  { %3759 = vmatprep.subr.bf16.mxu0 %v5193_v7  ;;  %3800 = vmatprep.subr.bf16.mxu1 %v5196_v36  ;;  %v5269_v33 = vld [vmem:[#allocation5 + $0x2b0] ss:$28 sps:$4 sm:$0xff]   ;;  %v5277_v36 = vld [vmem:[#allocation5 + $0x27c] ss:$28 sps:$4 sm:$0xff]  }
 0x391   :  { %v5272_v7 = vld [vmem:[#allocation5 + $0x630] ss:$28 sps:$4 sm:$0xff]  }
 0x393   :  { %3760 = vmatpush2.bf16.msra.mxu0 %v5191_v37  ;;  %3801 = vmatpush2.bf16.msra.mxu1 %v5194_v39  ;;  %v5280_v37 = vld [vmem:[#allocation5 + $0x5fc] ss:$28 sps:$4 sm:$0xff]  }
 0x394   :  { %3761 = vmatprep.subr.bf16.mxu0 %v5199_v40  ;;  %3802 = vmatprep.subr.bf16.mxu1 %v5202_v41  ;;  %v5275_v39 = vld [vmem:[#allocation5 + $0x278] ss:$28 sps:$4 sm:$0xff]   ;;  %v5283_v41 = vld [vmem:[#allocation5 + $0x244] ss:$28 sps:$4 sm:$0xff]  }
 0x395   :  { %v5278_v40 = vld [vmem:[#allocation5 + $0x5f8] ss:$28 sps:$4 sm:$0xff]  }
 0x397   :  { %3762 = vmatpush2.bf16.msra.mxu0 %v5197_v42  ;;  %3803 = vmatpush2.bf16.msra.mxu1 %v5200_v43  ;;  %v5286_v42 = vld [vmem:[#allocation5 + $0x5c4] ss:$28 sps:$4 sm:$0xff]  }
 0x398   :  { %3813 = vmatprep.subr.bf16.mxu0 %v5205_v44  ;;  %3854 = vmatprep.subr.bf16.mxu1 %v5208_v45  ;;  %v5281_v43 = vld [vmem:[#allocation5 + $0x240] ss:$28 sps:$4 sm:$0xff]   ;;  %v5289_v45 = vld [vmem:[#allocation5 + $0x20c] ss:$28 sps:$4 sm:$0xff]  }
 0x399   :  { %v5284_v44 = vld [vmem:[#allocation5 + $0x5c0] ss:$28 sps:$4 sm:$0xff]  }
 0x39a   :  { %3764 = vmatmul.mubr.bf16.vlgmr.msra.gmra.mxu0 %v5782_v38  ;;  %3805 = vmatmul.mubr.bf16.vlgmr.msra.gmra.mxu1 %v5784_v16 }
 0x39b   :  { %3814 = vmatpush1.bf16.msra.mxu0 %v5203_v46  ;;  %3845 = vmatprep.mubr.bf16.mxu0 %v5778_v51  ;;  %v5292_v46 = vld [vmem:[#allocation5 + $0x58c] ss:$28 sps:$4 sm:$0xff]  }
 0x39c   :  { %3855 = vmatpush1.bf16.msra.mxu1 %v5206_v48  ;;  %3886 = vmatprep.mubr.bf16.mxu1 %v5780_v34  ;;  %v5287_v48 = vld [vmem:[#allocation5 + $0x208] ss:$28 sps:$4 sm:$0xff]  }
 0x39d   :  { %3815 = vmatprep.subr.bf16.mxu0 %v5211_v49  ;;  %3856 = vmatprep.subr.bf16.mxu1 %v5214_v50  ;;  %v5290_v49 = vld [vmem:[#allocation5 + $0x588] ss:$28 sps:$4 sm:$0xff]   ;;  %v5295_v50 = vld [vmem:[#allocation5 + $0x1d4] ss:$28 sps:$4 sm:$0xff]  }
 0x39f   :  { %3816 = vmatpush1.bf16.msra.mxu0 %v5209_v52  ;;  %v5298_v52 = vld [vmem:[#allocation5 + $0x554] ss:$28 sps:$4 sm:$0xff]  }
 0x3a0   :  { %3857 = vmatpush1.bf16.msra.mxu1 %v5212_v53  ;;  %3817 = vmatprep.subr.bf16.mxu0 %v5217_v54  ;;  %v5293_v53 = vld [vmem:[#allocation5 + $0x1d0] ss:$28 sps:$4 sm:$0xff]  }
 0x3a1   :  { %3858 = vmatprep.subr.bf16.mxu1 %v5220_v55  ;;  %v5296_v54 = vld [vmem:[#allocation5 + $0x550] ss:$28 sps:$4 sm:$0xff]   ;;  %v5299_v55 = vld [vmem:[#allocation5 + $0x360] ss:$28 sps:$4 sm:$0xff]  }
 0x3a3   :  { %3818 = vmatpush1.bf16.msra.mxu0 %v5215_v56  ;;  %v5300_v56 = vld [vmem:[#allocation5 + $0x6e0] ss:$28 sps:$4 sm:$0xff]  }
 0x3a4   :  { %3859 = vmatpush1.bf16.msra.mxu1 %v5218_v57  ;;  %3819 = vmatprep.subr.bf16.mxu0 %v5223_v58  ;;  %v5301_v57 = vld [vmem:[#allocation5 + $0x1a0] ss:$28 sps:$4 sm:$0xff]  }
 0x3a5   :  { %3860 = vmatprep.subr.bf16.mxu1 %v5226_v15  ;;  %v5302_v58 = vld [vmem:[#allocation5 + $0x520] ss:$28 sps:$4 sm:$0xff]   ;;  %v5303_v15 = vld [vmem:[#allocation5 + $0x328] ss:$28 sps:$4 sm:$0xff]  }
 0x3a7   :  { %3820 = vmatpush1.bf16.msra.mxu0 %v5221_v59  ;;  %v5304_v59 = vld [vmem:[#allocation5 + $0x6a8] ss:$28 sps:$4 sm:$0xff]  }
 0x3a8   :  { %3861 = vmatpush1.bf16.msra.mxu1 %v5224_v60  ;;  %3821 = vmatprep.subr.bf16.mxu0 %v5229_v61  ;;  %v5305_v60 = vld [vmem:[#allocation5 + $0x168] ss:$28 sps:$4 sm:$0xff]  }
 0x3a9   :  { %3862 = vmatprep.subr.bf16.mxu1 %v5232_v62  ;;  %v5306_v61 = vld [vmem:[#allocation5 + $0x4e8] ss:$28 sps:$4 sm:$0xff]   ;;  %v5307_v62 = vld [vmem:[#allocation5 + $0x2f0] ss:$28 sps:$4 sm:$0xff]  }
 0x3ab   :  { %3822 = vmatpush1.bf16.msra.mxu0 %v5227_v63  ;;  %v5308_v63 = vld [vmem:[#allocation5 + $0x670] ss:$28 sps:$4 sm:$0xff]  }
 0x3ac   :  { %3863 = vmatpush1.bf16.msra.mxu1 %v5230_v1  ;;  %3823 = vmatprep.subr.bf16.mxu0 %v5235_v2  ;;  %v5309_v1 = vld [vmem:[#allocation5 + $0x130] ss:$28 sps:$4 sm:$0xff]  }
 0x3ad   :  { %3864 = vmatprep.subr.bf16.mxu1 %v5238_v3  ;;  %v5310_v2 = vld [vmem:[#allocation5 + $0x4b0] ss:$28 sps:$4 sm:$0xff]   ;;  %v5311_v3 = vld [vmem:[#allocation5 + $0x2b8] ss:$28 sps:$4 sm:$0xff]  }
 0x3af   :  { %3824 = vmatpush1.bf16.msra.mxu0 %v5233_v35  ;;  %v5312_v35 = vld [vmem:[#allocation5 + $0x638] ss:$28 sps:$4 sm:$0xff]  }
 0x3b0   :  { %3865 = vmatpush1.bf16.msra.mxu1 %v5236_v4  ;;  %3825 = vmatprep.subr.bf16.mxu0 %v5241_v5  ;;  %v5313_v4 = vld [vmem:[#allocation5 + $0xf8] ss:$28 sps:$4 sm:$0xff]   ;;  %v5315_v5 = vld [vmem:[#allocation5 + $0x280] ss:$28 sps:$4 sm:$0xff]  }
 0x3b1   :  { %3866 = vmatprep.subr.bf16.mxu1 %v5244_v8  ;;  %v5316_v8 = vld [vmem:[#allocation5 + $0x600] ss:$28 sps:$4 sm:$0xff]  }
 0x3b3   :  { %3826 = vmatpush1.bf16.msra.mxu0 %v5239_v9  ;;  %v5318_v9 = vld [vmem:[#allocation5 + $0x440] ss:$28 sps:$4 sm:$0xff]  }
 0x3b4   :  { %3867 = vmatpush1.bf16.msra.mxu1 %v5242_v10  ;;  %3827 = vmatprep.subr.bf16.mxu0 %v5247_v11  ;;  %v5319_v10 = vld [vmem:[#allocation5 + $0x248] ss:$28 sps:$4 sm:$0xff]  }
 0x3b5   :  { %3868 = vmatprep.subr.bf16.mxu1 %v5250_v12  ;;  %v5320_v11 = vld [vmem:[#allocation5 + $0x5c8] ss:$28 sps:$4 sm:$0xff]  }
 0x3b6   :  { %v5321_v12 = vld [vmem:[#allocation5 + $0x88] ss:$28 sps:$4 sm:$0xff]  }
 0x3b7   :  { %3828 = vmatpush1.bf16.msra.mxu0 %v5245_v13  ;;  %v5322_v13 = vld [vmem:[#allocation5 + $0x408] ss:$28 sps:$4 sm:$0xff]  }
 0x3b8   :  { %3869 = vmatpush1.bf16.msra.mxu1 %v5248_v14  ;;  %3829 = vmatprep.subr.bf16.mxu0 %v5253_v17  ;;  %v5323_v14 = vld [vmem:[#allocation5 + $0x210] ss:$28 sps:$4 sm:$0xff]  }
 0x3b9   :  { %3870 = vmatprep.subr.bf16.mxu1 %v5256_v18  ;;  %v5324_v17 = vld [vmem:[#allocation5 + $0x590] ss:$28 sps:$4 sm:$0xff]  }
 0x3ba   :  { %v5325_v18 = vld [vmem:[#allocation5 + $0x50] ss:$28 sps:$4 sm:$0xff]  }
 0x3bb   :  { %3830 = vmatpush2.bf16.msra.mxu0 %v5251_v23  ;;  %v5326_v23 = vld [vmem:[#allocation5 + $0x3d0] ss:$28 sps:$4 sm:$0xff]  }
 0x3bc   :  { %3871 = vmatpush2.bf16.msra.mxu1 %v5254_v24  ;;  %3831 = vmatprep.subr.bf16.mxu0 %v5259_v19  ;;  %v5327_v24 = vld [vmem:[#allocation5 + $0x1d8] ss:$28 sps:$4 sm:$0xff]  }
 0x3bd   :  { %3872 = vmatprep.subr.bf16.mxu1 %v5262_v25  ;;  %v5328_v19 = vld [vmem:[#allocation5 + $0x558] ss:$28 sps:$4 sm:$0xff]  }
 0x3be   :  { %v5329_v25 = vld [vmem:[#allocation5 + $0x18] ss:$28 sps:$4 sm:$0xff]  }
 0x3bf   :  { %3832 = vmatpush2.bf16.msra.mxu0 %v5257_v21  ;;  %v5330_v21 = vld [vmem:[#allocation5 + $0x398] ss:$28 sps:$4 sm:$0xff]  }
 0x3c0   :  { %3873 = vmatpush2.bf16.msra.mxu1 %v5260_v26  ;;  %3833 = vmatprep.subr.bf16.mxu0 %v5265_v20  ;;  %v5805_v26 = vld [vmem:[%s5832_s8] sm:$0xff]  ;;  %s5435_s8 = smov [#allocation7]  }
 0x3c1   :  { %3874 = vmatprep.subr.bf16.mxu1 %v5268_v27  ;;  %v2465_v20 = vrot.slane %v5805_v26, %v5742_v6  ;;  %v2469_v27 = vrot.slane %v5805_v26, %v5748_v0  ;;  %s4056_s1 = sshll.u32 %s5435_s8, 4  ;;  %s4057_s1 = int_to_ptr.vmem [resolvable:$true] %s4056_s1 }
 0x3c2   :  { %s5400_s7 = scalar_lea.vmem %s4057_s1, 448  ;;  %p5405_p11 = scmp.lt.s32.totalorder %s4057_s1, %s4057_s1 }
 0x3c3   :  { %3834 = vmatpush2.bf16.msra.mxu0 %v5263_v28  ;;  %p5401_p10 = scmp.ne.s32.totalorder %s4057_s1, %s5400_s7  ;;  %p5406_p12 = scmp.lt.s32.totalorder %s5400_s7, %s5400_s7 }
 0x3c4   :  { %3875 = vmatpush2.bf16.msra.mxu1 %v5266_v30  ;;  %3835 = vmatprep.subr.bf16.mxu0 %v5271_v31 }
 0x3c5   :  { %3876 = vmatprep.subr.bf16.mxu1 %v5274_v32  ;;  %p5407_p13 = por %p5406_p12, %p5405_p11 }
 0x3c7   :  { %3836 = vmatpush2.bf16.msra.mxu0 %v5269_v33  ;;  %p5408_p0 = pnand %p5407_p13, %p5401_p10 }
 0x3c8   :  { %3877 = vmatpush2.bf16.msra.mxu1 %v5272_v7  ;;  %3837 = vmatprep.subr.bf16.mxu0 %v5277_v36 }
 0x3c9   :  { %3878 = vmatprep.subr.bf16.mxu1 %v5280_v37 }
 0x3cb   :  { %3838 = vmatpush2.bf16.msra.mxu0 %v5275_v39 }
 0x3cc   :  { %3879 = vmatpush2.bf16.msra.mxu1 %v5278_v40  ;;  %3839 = vmatprep.subr.bf16.mxu0 %v5283_v41 }
 0x3cd   :  { %3880 = vmatprep.subr.bf16.mxu1 %v5286_v42 }
 0x3cf   :  { %3840 = vmatpush2.bf16.msra.mxu0 %v5281_v43 }
 0x3d0   :  { %3881 = vmatpush2.bf16.msra.mxu1 %v5284_v44  ;;  %3841 = vmatprep.subr.bf16.mxu0 %v5289_v45 }
 0x3d1   :  { %3882 = vmatprep.subr.bf16.mxu1 %v5292_v46 }
 0x3d3   :  { %3842 = vmatpush2.bf16.msra.mxu0 %v5287_v48 }
 0x3d4   :  { %3883 = vmatpush2.bf16.msra.mxu1 %v5290_v49  ;;  %3843 = vmatprep.subr.bf16.mxu0 %v5295_v50  ;;  %v2473_v49 = vrot.slane %v5805_v26, %v5757_v22  ;;  %v2477_v50 = vrot.slane %v5805_v26, %v5760_v29 }
 0x3d5   :  { %3884 = vmatprep.subr.bf16.mxu1 %v5298_v52 }
 0x3d7   :  { %3844 = vmatpush2.bf16.msra.mxu0 %v5293_v53 }
 0x3d8   :  { %3885 = vmatpush2.bf16.msra.mxu1 %v5296_v54  ;;  %4613 = vmatprep.subr.bf16.mxu0 %v5299_v55 }
 0x3d9   :  { %4635 = vmatprep.subr.bf16.mxu1 %v5300_v56 }
 0x3da   :  { %3846 = vmatmul.mubr.bf16.vlgmr.msra.gmra.mxu0 %v5782_v38 }
 0x3db   :  { %3887 = vmatmul.mubr.bf16.vlgmr.msra.gmra.mxu1 %v5784_v16  ;;  %4614 = vmatpush3.bf16.msra.mxu0 %v5301_v57 }
 0x3dc   :  { %3927 = vmatprep.mubr.bf16.mxu0 %v5778_v51  ;;  %4636 = vmatpush3.bf16.msra.mxu1 %v5302_v58  ;;  %v5314_v51 = vld [vmem:[#allocation5 + $0x478] ss:$28 sps:$4 sm:$0xff]  }
 0x3dd   :  { %3967 = vmatprep.mubr.bf16.mxu1 %v5780_v34  ;;  %4615 = vmatprep.subr.bf16.mxu0 %v5303_v15  ;;  %v5317_v34 = vld [vmem:[#allocation5 + $0xc0] ss:$28 sps:$4 sm:$0xff]  }
 0x3de   :  { %4637 = vmatprep.subr.bf16.mxu1 %v5304_v59 }
 0x3df   :  { %4616 = vmatpush3.bf16.msra.mxu0 %v5305_v60 }
 0x3e0   :  { %4638 = vmatpush3.bf16.msra.mxu1 %v5306_v61  ;;  %4617 = vmatprep.subr.bf16.mxu0 %v5307_v62 }
 0x3e1   :  { %4639 = vmatprep.subr.bf16.mxu1 %v5308_v63 }
 0x3e3   :  { %4618 = vmatpush3.bf16.msra.mxu0 %v5309_v1 }
 0x3e4   :  { %4640 = vmatpush3.bf16.msra.mxu1 %v5310_v2  ;;  %4619 = vmatprep.subr.bf16.mxu0 %v5311_v3 }
 0x3e5   :  { %4641 = vmatprep.subr.bf16.mxu1 %v5312_v35 }
 0x3e7   :  { %4620 = vmatpush3.bf16.msra.mxu0 %v5313_v4 }
 0x3e8   :  { %4642 = vmatpush3.bf16.msra.mxu1 %v5314_v51  ;;  %4621 = vmatprep.subr.bf16.mxu0 %v5315_v5  ;;  %v2480_v5 = vsub.s32 4, %v5739_v47 }
 0x3e9   :  { %4643 = vmatprep.subr.bf16.mxu1 %v5316_v8  ;;  %v2484_v8 = vsub.s32 5, %v5739_v47 }
 0x3eb   :  { %4622 = vmatpush3.bf16.msra.mxu0 %v5317_v34  ;;  %v2481_v34 = vrot.slane %v5805_v26, %v2480_v5 }
 0x3ec   :  { %4644 = vmatpush3.bf16.msra.mxu1 %v5318_v9  ;;  %4623 = vmatprep.subr.bf16.mxu0 %v5319_v10  ;;  %v2485_v9 = vrot.slane %v5805_v26, %v2484_v8 }
 0x3ed   :  { %4645 = vmatprep.subr.bf16.mxu1 %v5320_v11 }
 0x3ef   :  { %4624 = vmatpush3.bf16.msra.mxu0 %v5321_v12 }
 0x3f0   :  { %4646 = vmatpush3.bf16.msra.mxu1 %v5322_v13  ;;  %4625 = vmatprep.subr.bf16.mxu0 %v5323_v14 }
 0x3f1   :  { %4647 = vmatprep.subr.bf16.mxu1 %v5324_v17 }
 0x3f3   :  { %4626 = vmatpush3.bf16.msra.mxu0 %v5325_v18 }
 0x3f4   :  { %4648 = vmatpush3.bf16.msra.mxu1 %v5326_v23  ;;  %4627 = vmatprep.subr.bf16.mxu0 %v5327_v24 }
 0x3f5   :  { %4649 = vmatprep.subr.bf16.mxu1 %v5328_v19 }
 0x3f7   :  { %4628 = vmatpush3.bf16.msra.mxu0 %v5329_v25 }
 0x3f8   :  { %4650 = vmatpush3.bf16.msra.mxu1 %v5330_v21 }
 0x3fa   :  { %3928 = vmatmul.mubr.bf16.vlgmr.msra.gmra.mxu0 %v5782_v38 }
 0x3fb   :  { %3968 = vmatmul.mubr.bf16.vlgmr.msra.gmra.mxu1 %v5784_v16 }
 0x41a   :  { %v3683_v28 = vpop.f32.mrf.mxu0  ;;  %v3724_v30 = vpop.f32.mrf.mxu1 }
 0x41b   :  { %v3684_v31 = vadd.f32 %v3683_v28, %v2465_v20 }
 0x41c   :  { %v3685_v32 = vpop.f32.mrf.mxu0  ;;  %v3726_v33 = vpop.f32.mrf.mxu1 }
 0x41d   :  { %v3725_v7 = vadd.f32 %v3724_v30, %v3684_v31  ;;  %v3686_v38 = vadd.f32 %v3685_v32, %v2469_v27 }
 0x41e   :  { %v3687_v36 = vpop.f32.mrf.mxu0  ;;  %v3728_v16 = vpop.f32.mrf.mxu1 }
 0x41f   :  { %v4528_v37 = vmul.f32 -1.442695, %v3725_v7  ;;  %v3727_v39 = vadd.f32 %v3726_v33, %v3686_v38  ;;  %v2488_v33 = vsub.s32 6, %v5739_v47 }
 0x420   :  { %v3688_v40 = vpop.f32.mrf.mxu0  ;;  %v3729_v41 = vpop.f32.mrf.mxu1 }
 0x421   :  { %5331 = vpow2.f32 %v4528_v37  ;;  %v4529_v42 = vmul.f32 -1.442695, %v3727_v39  ;;  %v2489_v36 = vrot.slane %v5805_v26, %v2488_v33 }
 0x423   :  { %5333 = vpow2.f32 %v4529_v42 }
 0x42e   :  { %v5332_v6 = vpop.eup %5331 }
 0x42f   :  { %v3996_v43 = vadd.f32 1.0, %v5332_v6 }
 0x430   :  { %v5334_v44 = vpop.eup %5333 }
 0x431   :  { %v3997_v0 = vadd.f32 1.0, %v5334_v44  ;;  %5335 = vrcp.f32 %v3996_v43 }
 0x433   :  { %5337 = vrcp.f32 %v3997_v0 }
 0x43e   :  { %v5336_v45 = vpop.eup %5335 }
 0x440   :  { %v5338_v46 = vpop.eup %5337 }
 0x441   :  { %v4539_v48 = vpack.c.bf16 %v5338_v46, %v5336_v45 }
 0x443   :  { %4046 = vst [vmem:[#allocation7] sm:$0xff] %v4539_v48 }
 0x45a   :  { %v3765_v52 = vpop.f32.mrf.mxu0  ;;  %v3806_v53 = vpop.f32.mrf.mxu1 }
 0x45b   :  { %v3766_v54 = vadd.f32 %v3765_v52, %v2473_v49 }
 0x45c   :  { %v3767_v55 = vpop.f32.mrf.mxu0  ;;  %v3808_v56 = vpop.f32.mrf.mxu1 }
 0x45d   :  { %v3807_v57 = vadd.f32 %v3806_v53, %v3766_v54  ;;  %v3768_v58 = vadd.f32 %v3767_v55, %v2477_v50 }
 0x45e   :  { %v3769_v15 = vpop.f32.mrf.mxu0  ;;  %v3810_v59 = vpop.f32.mrf.mxu1 }
 0x45f   :  { %v4530_v60 = vmul.f32 -1.442695, %v3807_v57  ;;  %v3809_v61 = vadd.f32 %v3808_v56, %v3768_v58 }
 0x460   :  { %v3770_v62 = vpop.f32.mrf.mxu0  ;;  %v3811_v63 = vpop.f32.mrf.mxu1 }
 0x461   :  { %5339 = vpow2.f32 %v4530_v60  ;;  %v4531_v1 = vmul.f32 -1.442695, %v3809_v61 }
 0x463   :  { %5341 = vpow2.f32 %v4531_v1 }
 0x46e   :  { %v5340_v22 = vpop.eup %5339 }
 0x46f   :  { %v3998_v2 = vadd.f32 1.0, %v5340_v22 }
 0x470   :  { %v5342_v3 = vpop.eup %5341 }
 0x471   :  { %v3999_v29 = vadd.f32 1.0, %v5342_v3  ;;  %5343 = vrcp.f32 %v3998_v2 }
 0x473   :  { %5345 = vrcp.f32 %v3999_v29 }
 0x47e   :  { %v5344_v35 = vpop.eup %5343 }
 0x480   :  { %v5346_v4 = vpop.eup %5345 }
 0x481   :  { %v4540_v51 = vpack.c.bf16 %v5346_v4, %v5344_v35 }
 0x483   :  { %4047 = vst [vmem:[#allocation7 + $0x8] sm:$0xff] %v4540_v51 }
 0x49a   :  { %v3847_v10 = vpop.f32.mrf.mxu0 }
 0x49b   :  { %v3848_v11 = vadd.f32 %v3847_v10, %v2481_v34  ;;  %v3888_v12 = vpop.f32.mrf.mxu1 }
 0x49c   :  { %v3849_v13 = vpop.f32.mrf.mxu0 }
 0x49d   :  { %v3889_v14 = vadd.f32 %v3888_v12, %v3848_v11  ;;  %v3850_v17 = vadd.f32 %v3849_v13, %v2485_v9  ;;  %v3890_v18 = vpop.f32.mrf.mxu1 }
 0x49e   :  { %v3851_v23 = vpop.f32.mrf.mxu0 }
 0x49f   :  { %v4532_v24 = vmul.f32 -1.442695, %v3889_v14  ;;  %v3891_v19 = vadd.f32 %v3890_v18, %v3850_v17  ;;  %v3892_v25 = vpop.f32.mrf.mxu1 }
 0x4a0   :  { %v3852_v21 = vpop.f32.mrf.mxu0 }
 0x4a1   :  { %5347 = vpow2.f32 %v4532_v24  ;;  %v4533_v20 = vmul.f32 -1.442695, %v3891_v19  ;;  %v3893_v27 = vpop.f32.mrf.mxu1 }
 0x4a3   :  { %5349 = vpow2.f32 %v4533_v20 }
 0x4ae   :  { %v5348_v28 = vpop.eup %5347 }
 0x4af   :  { %v4000_v30 = vadd.f32 1.0, %v5348_v28 }
 0x4b0   :  { %v5350_v31 = vpop.eup %5349 }
 0x4b1   :  { %v4001_v32 = vadd.f32 1.0, %v5350_v31  ;;  %5351 = vrcp.f32 %v4000_v30 }
 0x4b3   :  { %5353 = vrcp.f32 %v4001_v32 }
 0x4ba   :  { %v4629_v7 = vpop.f32.mrf.mxu0 }
 0x4bb   :  { %v4651_v38 = vpop.f32.mrf.mxu1 }
 0x4bc   :  { %v4630_v16 = vpop.f32.mrf.mxu0 }
 0x4bd   :  { %v4631_v37 = vadd.f32 %v4630_v16, %v4629_v7  ;;  %v4652_v39 = vpop.f32.mrf.mxu1 }
 0x4be   :  { %v4632_v40 = vpop.f32.mrf.mxu0  ;;  %v5352_v41 = vpop.eup %5351  ;;  %v4653_v6 = vadd.f32 %v4652_v39, %v4651_v38 }
 0x4bf   :  { %v3930_v42 = vadd.f32 %v4631_v37, %v2489_v36  ;;  %v4654_v43 = vpop.f32.mrf.mxu1 }
 0x4c0   :  { %v5354_v44 = vpop.eup %5353  ;;  %v4633_v0 = vpop.f32.mrf.mxu0 }
 0x4c1   :  { %v3970_v45 = vadd.f32 %v4653_v6, %v3930_v42  ;;  %v4655_v46 = vpop.f32.mrf.mxu1  ;;  %v4541_v48 = vpack.c.bf16 %v5354_v44, %v5352_v41 }
 0x4c3   :  { %v4534_v49 = vmul.f32 -1.442695, %v3970_v45  ;;  %4048 = vst [vmem:[#allocation7 + $0x10] sm:$0xff] %v4541_v48 }
 0x4c5   :  { %5355 = vpow2.f32 %v4534_v49 }
 0x4d2   :  { %v5356_v47 = vpop.eup %5355 }
 0x4d3   :  { %v4002_v50 = vadd.f32 1.0, %v5356_v47 }
 0x4d5   :  { %5357 = vrcp.f32 %v4002_v50 }
 0x4e2   :  { %v5358_v26 = vpop.eup %5357 }
 0x4e3   :  { %v4542_v52 = vpack.c.bf16 %v5358_v26, %v5358_v26 }
 0x4e5   :  { %4049 = vst [vmem:[#allocation7 + $0x18] sm:$0xf] %v4542_v52 }
 0x4e6   :  { %5411 = shalt.err (!%p5408_p0)
}
 0x4e7   :  { %4059 = dma.vmem_to_hbm [thread:$0]  %s4057_s1, 448, %s5833_s9, [#allocation4]  }
 0x4e8   :  { %5424 = dma.done.wait [#allocation4], 448  }
 0x4e9   :  { %5425 = vsyncadd [#allocation4], 4294966848 }
 0x4ea   :  { %4063 = vsyncpa [#allocation3], 1 }
 0x4eb   :  { %4064 = vsyncpa [#allocation6], 1 }
 0x4ec   :  { %4065 = vsyncpa [#allocation4], 1 }

</bundles_post_ra>
